<compile_context>
chip_gen: v7x
topology: tpu7x:2x2x1
jax: 0.10.0
libtpu: 0.0.40
codegen_flags: <defaults>
</compile_context>

<pallas_src>
import math

import numpy as np
import jax
import jax.numpy as jnp
from jax.experimental import pallas as pl
from jax.experimental.pallas import tpu as pltpu

# ----------------------------- tiny BERT config -----------------------------
VOCAB = 64
HIDDEN = 32
NUM_LAYERS = 2
NUM_HEADS = 4
HEAD_DIM = HIDDEN // NUM_HEADS
INTERMEDIATE = 64
MAX_POS = 16
NUM_CLASSES = 3 + 7 + 8          # gravita / tipologia / enti fused head
LN_EPS = 1e-12
LANES = 128
VMEM_LIMIT_BYTES = 32 * 1024 * 1024

# --------------------------- weight-slab row layout --------------------------
WORD_OFF = 0                               # (VOCAB, HIDDEN)
POS_OFF = WORD_OFF + VOCAB                 # (MAX_POS, HIDDEN)  pos_emb + type_emb[0]
POOLW_OFF = POS_OFF + MAX_POS              # (HIDDEN, HIDDEN)
HEADW_OFF = POOLW_OFF + HIDDEN             # (HIDDEN, NUM_CLASSES) zero-padded to 128
GVEC_OFF = HEADW_OFF + HIDDEN              # 8 rows: emb_ln_g, emb_ln_b, pool_b, head_b
LAYER_OFF = GVEC_OFF + 8

L_QKV_W = 0                                # (HIDDEN, 3*HIDDEN)
L_AO_W = L_QKV_W + HIDDEN                  # (HIDDEN, HIDDEN)
L_I_W = L_AO_W + HIDDEN                    # (HIDDEN, INTERMEDIATE)
L_O_W = L_I_W + HIDDEN                     # (INTERMEDIATE, HIDDEN)
L_VEC = L_O_W + INTERMEDIATE               # 8 rows: qkv_b, ao_b, ln1_g, ln1_b, i_b, o_b, ln2_g, ln2_b
LAYER_ROWS = L_VEC + 8

TOTAL_ROWS = LAYER_OFF + NUM_LAYERS * LAYER_ROWS   # 488 (multiple of 8)


# ------------------------------ in-kernel helpers ----------------------------
def _ln(x, g, b):
    mu = jnp.mean(x, axis=-1, keepdims=True)
    var = jnp.mean(jnp.square(x - mu), axis=-1, keepdims=True)
    return (x - mu) * jax.lax.rsqrt(var + LN_EPS) * g + b


def _gelu(y):
    # TODO(synk): HF BERT default is exact erf-GELU; tanh approximation used here.
    return 0.5 * y * (1.0 + jnp.tanh(0.7978845608028654 * (y + 0.044715 * y * y * y)))


# ----------------------- single fused whole-forward kernel -------------------
def _bert_forward_kernel(ids_ref, mask_ref, slab_ref, out_ref):
    """One batch element: embedding + 2 encoder layers + pooler + heads."""
    S = ids_ref.shape[0]
    H = HIDDEN

    # ---- embedding: one-hot(input_ids) @ word_emb on the MXU (no gather) ----
    ids = ids_ref[...]                                              # (S, 1) int32
    vocab_iota = jax.lax.broadcasted_iota(jnp.int32, (S, VOCAB), 1)
    one_hot = (vocab_iota == ids).astype(jnp.float32)               # (S, VOCAB)
    x = jnp.dot(one_hot, slab_ref[WORD_OFF:WORD_OFF + VOCAB, 0:H],
                preferred_element_type=jnp.float32)                 # (S, H)
    x = x + slab_ref[POS_OFF:POS_OFF + S, 0:H]                      # pos + type(0) folded
    x = _ln(x, slab_ref[GVEC_OFF:GVEC_OFF + 1, 0:H],
            slab_ref[GVEC_OFF + 1:GVEC_OFF + 2, 0:H])

    mask_bias = (1.0 - mask_ref[...]) * -1e9                        # (1, S) additive bias
    scale = 1.0 / math.sqrt(HEAD_DIM)

    # ---- encoder layers (static unroll; weights are slab slices) ------------
    for l in range(NUM_LAYERS):
        base = LAYER_OFF + l * LAYER_ROWS
        vec = base + L_VEC

        qkv = jnp.dot(x, slab_ref[base + L_QKV_W:base + L_QKV_W + H, 0:3 * H],
                      preferred_element_type=jnp.float32) \
              + slab_ref[vec:vec + 1, 0:3 * H]                      # (S, 3H)

        ctx_heads = []
        for h in range(NUM_HEADS):                                  # lane slices of the QKV slab
            q_h = qkv[:, h * HEAD_DIM:(h + 1) * HEAD_DIM]
            k_h = qkv[:, H + h * HEAD_DIM:H + (h + 1) * HEAD_DIM]
            v_h = qkv[:, 2 * H + h * HEAD_DIM:2 * H + (h + 1) * HEAD_DIM]
            s = jax.lax.dot_general(q_h, k_h, (((1,), (1,)), ((), ())),
                                    preferred_element_type=jnp.float32) * scale
            s = s + mask_bias
            s = s - jnp.max(s, axis=-1, keepdims=True)
            p = jnp.exp(s)
            p = p / jnp.sum(p, axis=-1, keepdims=True)
            ctx_heads.append(jnp.dot(p, v_h, preferred_element_type=jnp.float32))
        ctx = jnp.concatenate(ctx_heads, axis=-1)                   # (S, H)

        attn = jnp.dot(ctx, slab_ref[base + L_AO_W:base + L_AO_W + H, 0:H],
                       preferred_element_type=jnp.float32) \
               + slab_ref[vec + 1:vec + 2, 0:H]
        h1 = _ln(attn + x,
                 slab_ref[vec + 2:vec + 3, 0:H],
                 slab_ref[vec + 3:vec + 4, 0:H])

        inter = _gelu(jnp.dot(h1, slab_ref[base + L_I_W:base + L_I_W + H, 0:INTERMEDIATE],
                              preferred_element_type=jnp.float32)
                      + slab_ref[vec + 4:vec + 5, 0:INTERMEDIATE])
        ffn = jnp.dot(inter, slab_ref[base + L_O_W:base + L_O_W + INTERMEDIATE, 0:H],
                      preferred_element_type=jnp.float32) \
              + slab_ref[vec + 5:vec + 6, 0:H]
        x = _ln(ffn + h1,
                slab_ref[vec + 6:vec + 7, 0:H],
                slab_ref[vec + 7:vec + 8, 0:H])

    # ---- pooler + fused classification heads (lane-dense 128-wide output) ---
    cls = x[0:1, :]                                                  # first token
    pooled = jnp.tanh(jnp.dot(cls, slab_ref[POOLW_OFF:POOLW_OFF + H, 0:H],
                              preferred_element_type=jnp.float32)
                      + slab_ref[GVEC_OFF + 2:GVEC_OFF + 3, 0:H])
    logits = jnp.dot(pooled, slab_ref[HEADW_OFF:HEADW_OFF + H, :],   # (32, 128) zero-padded
                     preferred_element_type=jnp.float32) \
             + slab_ref[GVEC_OFF + 3:GVEC_OFF + 4, :]
    out_ref[...] = logits.astype(out_ref.dtype)                      # (1, 128)


# ------------------------------ model (glue) ---------------------------------
def bert_multitask_forward(weight_slab, input_ids, attention_mask=None):
    B, S = input_ids.shape
    if attention_mask is None:
        attention_mask = jnp.ones((B, S), dtype=jnp.int32)
    ids3 = input_ids.astype(jnp.int32).reshape(B, S, 1)
    maskf = attention_mask.astype(jnp.float32).reshape(B, 1, S)
    R = weight_slab.shape[0]

    out = pl.pallas_call(
        _bert_forward_kernel,
        grid=(B,),
        in_specs=[pl.BlockSpec((None, S, 1), lambda b: (b, 0, 0)),
                  pl.BlockSpec((None, 1, S), lambda b: (b, 0, 0)),
                  pl.BlockSpec((R, LANES), lambda b: (0, 0))],
        out_specs=pl.BlockSpec((None, 1, LANES), lambda b: (b, 0, 0)),
        out_shape=jax.ShapeDtypeStruct((B, 1, LANES), jnp.float32),
        compiler_params=pltpu.CompilerParams(
            dimension_semantics=("parallel",),      # batch axis feeds both TCs on v7x
            vmem_limit_bytes=VMEM_LIMIT_BYTES),
    )(ids3, maskf, weight_slab)

    logits = out[:, 0, :]
    return {
        "gravita": logits[:, 0:3],
        "tipologia": logits[:, 3:10],
        "enti": logits[:, 10:18],
    }


# --------------------- pack all weights into one (R,128) slab ----------------
def pack_weights(params):
    """Done once, outside jit: every matrix/bias lives at a static row offset,
    lane offset 0, zero-padded to 128 lanes."""
    slab = np.zeros((TOTAL_ROWS, LANES), np.float32)

    def put(row, arr):
        arr = np.asarray(arr, np.float32)
        if arr.ndim == 1:
            arr = arr[None, :]
        slab[row:row + arr.shape[0], :arr.shape[1]] = arr

    put(WORD_OFF, params["word_emb"])
    put(POS_OFF, np.asarray(params["pos_emb"]) + np.asarray(params["type_emb"])[0][None, :])
    put(POOLW_OFF, params["pool_w"])
    put(HEADW_OFF, np.concatenate([np.asarray(params["grav_w"]),
                                   np.asarray(params["tip_w"]),
                                   np.asarray(params["enti_w"])], axis=1))
    put(GVEC_OFF + 0, params["emb_ln_g"])
    put(GVEC_OFF + 1, params["emb_ln_b"])
    put(GVEC_OFF + 2, params["pool_b"])
    put(GVEC_OFF + 3, np.concatenate([np.asarray(params["grav_b"]),
                                      np.asarray(params["tip_b"]),
                                      np.asarray(params["enti_b"])]))
    for l, p in enumerate(params["layers"]):
        base = LAYER_OFF + l * LAYER_ROWS
        put(base + L_QKV_W, np.concatenate([np.asarray(p["q_w"]),
                                            np.asarray(p["k_w"]),
                                            np.asarray(p["v_w"])], axis=1))
        put(base + L_AO_W, p["ao_w"])
        put(base + L_I_W, p["i_w"])
        put(base + L_O_W, p["o_w"])
        vec = base + L_VEC
        put(vec + 0, np.concatenate([np.asarray(p["q_b"]),
                                     np.asarray(p["k_b"]),
                                     np.asarray(p["v_b"])]))
        put(vec + 1, p["ao_b"])
        put(vec + 2, p["ln1_g"])
        put(vec + 3, p["ln1_b"])
        put(vec + 4, p["i_b"])
        put(vec + 5, p["o_b"])
        put(vec + 6, p["ln2_g"])
        put(vec + 7, p["ln2_b"])
    return jnp.asarray(slab)


# --------------------------- deterministic init -------------------------------
def init_params(seed=0):
    key = jax.random.PRNGKey(seed)
    counter = [0]

    def nrm(shape, std=0.02):
        counter[0] += 1
        return std * jax.random.normal(jax.random.fold_in(key, counter[0]),
                                       shape, jnp.float32)

    zeros = lambda n: jnp.zeros((n,), jnp.float32)
    ones = lambda n: jnp.ones((n,), jnp.float32)

    params = {
        "word_emb": nrm((VOCAB, HIDDEN)),
        "pos_emb": nrm((MAX_POS, HIDDEN)),
        "type_emb": nrm((2, HIDDEN)),
        "emb_ln_g": ones(HIDDEN), "emb_ln_b": zeros(HIDDEN),
        "pool_w": nrm((HIDDEN, HIDDEN)), "pool_b": zeros(HIDDEN),
        "grav_w": nrm((HIDDEN, 3)), "grav_b": zeros(3),
        "tip_w": nrm((HIDDEN, 7)), "tip_b": zeros(7),
        "enti_w": nrm((HIDDEN, 8)), "enti_b": zeros(8),
        "layers": [],
    }
    for _ in range(NUM_LAYERS):
        params["layers"].append({
            "q_w": nrm((HIDDEN, HIDDEN)), "q_b": zeros(HIDDEN),
            "k_w": nrm((HIDDEN, HIDDEN)), "k_b": zeros(HIDDEN),
            "v_w": nrm((HIDDEN, HIDDEN)), "v_b": zeros(HIDDEN),
            "ao_w": nrm((HIDDEN, HIDDEN)), "ao_b": zeros(HIDDEN),
            "ln1_g": ones(HIDDEN), "ln1_b": zeros(HIDDEN),
            "i_w": nrm((HIDDEN, INTERMEDIATE)), "i_b": zeros(INTERMEDIATE),
            "o_w": nrm((INTERMEDIATE, HIDDEN)), "o_b": zeros(HIDDEN),
            "ln2_g": ones(HIDDEN), "ln2_b": zeros(HIDDEN),
        })
    return params


if __name__ == "__main__":
    params = init_params(0)
    weight_slab = pack_weights(params)          # built once, outside jit

    key = jax.random.PRNGKey(0)
    B, S = 2, 8
    input_ids = jax.random.randint(jax.random.fold_in(key, 1000), (B, S), 0, VOCAB)
    attention_mask = jnp.array([[1] * S, [1] * (S - 2) + [0, 0]], dtype=jnp.int32)

    fwd = jax.jit(bert_multitask_forward)
    out = fwd(weight_slab, input_ids, attention_mask)
    jax.block_until_ready(out)

    assert out["gravita"].shape == (B, 3)
    assert out["tipologia"].shape == (B, 7)
    assert out["enti"].shape == (B, 8)
    assert bool(jnp.all(jnp.isfinite(out["gravita"])))
    assert bool(jnp.all(jnp.isfinite(out["tipologia"])))
    assert bool(jnp.all(jnp.isfinite(out["enti"])))
    print("KERNEL_OK")
</pallas_src>

<mosaic_0001>
module attributes {stable_mosaic.version = 11 : i64} {
  func.func @_bert_forward_kernel(%arg0: i32, %arg1: memref<1x8x1xi32, #tpu.memory_space<vmem>>, %arg2: memref<1x1x8xf32, #tpu.memory_space<vmem>>, %arg3: memref<488x128xf32, #tpu.memory_space<vmem>>, %arg4: memref<1x1x128xf32, #tpu.memory_space<vmem>>) attributes {dimension_semantics = [#tpu.dimension_semantics<parallel>], iteration_bounds = array<i64: 2>, scalar_prefetch = 0 : i64, scratch_operands = 0 : i64, tpu.core_type = #tpu.core_type<tc>, window_params = [{transform_indices = @transform_0, window_bounds = array<i64: 1, 8, 1>}, {transform_indices = @transform_1, window_bounds = array<i64: 1, 1, 8>}, {pipeline_mode = #tpu.pipeline_mode<synchronous>, transform_indices = @transform_2, window_bounds = array<i64: 488, 128>}, {transform_indices = @transform_3, window_bounds = array<i64: 1, 1, 128>}]} {
    %c0 = arith.constant 0 : index
    %c0_0 = arith.constant 0 : index
    %c0_1 = arith.constant 0 : index
    %0 = vector.load %arg1[%c0, %c0_0, %c0_1] : memref<1x8x1xi32, #tpu.memory_space<vmem>>, vector<1x8x1xi32>
    %1 = vector.shape_cast %0 : vector<1x8x1xi32> to vector<8x1xi32>
    %2 = tpu.iota {dimensions = array<i32: 1>} : vector<8x64xi32>
    %3 = vector.broadcast %1 : vector<8x1xi32> to vector<8x64xi32>
    %4 = arith.cmpi eq, %2, %3 : vector<8x64xi32>
    %5 = arith.extui %4 : vector<8x64xi1> to vector<8x64xi32>
    %6 = arith.sitofp %5 : vector<8x64xi32> to vector<8x64xf32>
    %c0_2 = arith.constant 0 : index
    %c0_3 = arith.constant 0 : index
    %7 = vector.load %arg3[%c0_2, %c0_3] : memref<488x128xf32, #tpu.memory_space<vmem>>, vector<64x32xf32>
    %cst = arith.constant dense<0.000000e+00> : vector<8x32xf32>
    %8 = tpu.matmul %6, %7, %cst {dimension_numbers = #tpu.dot_dimension_numbers<[1], [0], [0], [1], [0, 0, 1, 1], [], []>} : vector<8x64xf32>, vector<64x32xf32>, vector<8x32xf32> -> vector<8x32xf32>
    %c64 = arith.constant 64 : index
    %c0_4 = arith.constant 0 : index
    %9 = vector.load %arg3[%c64, %c0_4] : memref<488x128xf32, #tpu.memory_space<vmem>>, vector<8x32xf32>
    %10 = arith.addf %8, %9 : vector<8x32xf32>
    %c144 = arith.constant 144 : index
    %c0_5 = arith.constant 0 : index
    %11 = vector.load %arg3[%c144, %c0_5] : memref<488x128xf32, #tpu.memory_space<vmem>>, vector<1x32xf32>
    %c145 = arith.constant 145 : index
    %c0_6 = arith.constant 0 : index
    %12 = vector.load %arg3[%c145, %c0_6] : memref<488x128xf32, #tpu.memory_space<vmem>>, vector<1x32xf32>
    %cst_7 = arith.constant dense<0.000000e+00> : vector<8xf32>
    %13 = vector.multi_reduction <add>, %10, %cst_7 [1] : vector<8x32xf32> to vector<8xf32>
    %14 = vector.shape_cast %13 : vector<8xf32> to vector<8x1xf32>
    %cst_8 = arith.constant 3.200000e+01 : f32
    %15 = vector.broadcast %cst_8 : f32 to vector<8x1xf32>
    %16 = arith.divf %14, %15 : vector<8x1xf32>
    %17 = vector.broadcast %16 : vector<8x1xf32> to vector<8x32xf32>
    %18 = arith.subf %10, %17 : vector<8x32xf32>
    %19 = arith.mulf %18, %18 : vector<8x32xf32>
    %cst_9 = arith.constant dense<0.000000e+00> : vector<8xf32>
    %20 = vector.multi_reduction <add>, %19, %cst_9 [1] : vector<8x32xf32> to vector<8xf32>
    %21 = vector.shape_cast %20 : vector<8xf32> to vector<8x1xf32>
    %cst_10 = arith.constant 3.200000e+01 : f32
    %22 = vector.broadcast %cst_10 : f32 to vector<8x1xf32>
    %23 = arith.divf %21, %22 : vector<8x1xf32>
    %24 = vector.broadcast %16 : vector<8x1xf32> to vector<8x32xf32>
    %25 = arith.subf %10, %24 : vector<8x32xf32>
    %cst_11 = arith.constant 9.99999996E-13 : f32
    %26 = vector.broadcast %cst_11 : f32 to vector<8x1xf32>
    %27 = arith.addf %23, %26 : vector<8x1xf32>
    %28 = math.rsqrt %27 : vector<8x1xf32>
    %29 = vector.broadcast %28 : vector<8x1xf32> to vector<8x32xf32>
    %30 = arith.mulf %25, %29 : vector<8x32xf32>
    %31 = vector.broadcast %11 : vector<1x32xf32> to vector<8x32xf32>
    %32 = arith.mulf %30, %31 : vector<8x32xf32>
    %33 = vector.broadcast %12 : vector<1x32xf32> to vector<8x32xf32>
    %34 = arith.addf %32, %33 : vector<8x32xf32>
    %c0_12 = arith.constant 0 : index
    %c0_13 = arith.constant 0 : index
    %c0_14 = arith.constant 0 : index
    %35 = vector.load %arg2[%c0_12, %c0_13, %c0_14] : memref<1x1x8xf32, #tpu.memory_space<vmem>>, vector<1x1x8xf32>
    %36 = vector.shape_cast %35 : vector<1x1x8xf32> to vector<1x8xf32>
    %cst_15 = arith.constant 1.000000e+00 : f32
    %37 = vector.broadcast %cst_15 : f32 to vector<1x8xf32>
    %38 = arith.subf %37, %36 : vector<1x8xf32>
    %cst_16 = arith.constant -1.000000e+09 : f32
    %39 = vector.broadcast %cst_16 : f32 to vector<1x8xf32>
    %40 = arith.mulf %38, %39 : vector<1x8xf32>
    %c152 = arith.constant 152 : index
    %c0_17 = arith.constant 0 : index
    %41 = vector.load %arg3[%c152, %c0_17] : memref<488x128xf32, #tpu.memory_space<vmem>>, vector<32x96xf32>
    %cst_18 = arith.constant dense<0.000000e+00> : vector<8x96xf32>
    %42 = tpu.matmul %34, %41, %cst_18 {dimension_numbers = #tpu.dot_dimension_numbers<[1], [0], [0], [1], [0, 0, 1, 1], [], []>} : vector<8x32xf32>, vector<32x96xf32>, vector<8x96xf32> -> vector<8x96xf32>
    %c312 = arith.constant 312 : index
    %c0_19 = arith.constant 0 : index
    %43 = vector.load %arg3[%c312, %c0_19] : memref<488x128xf32, #tpu.memory_space<vmem>>, vector<1x96xf32>
    %44 = vector.broadcast %43 : vector<1x96xf32> to vector<8x96xf32>
    %45 = arith.addf %42, %44 : vector<8x96xf32>
    %46 = vector.extract_strided_slice %45 {offsets = [0, 0], sizes = [8, 8], strides = [1, 1]} : vector<8x96xf32> to vector<8x8xf32>
    %47 = vector.extract_strided_slice %45 {offsets = [0, 32], sizes = [8, 8], strides = [1, 1]} : vector<8x96xf32> to vector<8x8xf32>
    %48 = vector.extract_strided_slice %45 {offsets = [0, 64], sizes = [8, 8], strides = [1, 1]} : vector<8x96xf32> to vector<8x8xf32>
    %cst_20 = arith.constant dense<0.000000e+00> : vector<8x8xf32>
    %49 = tpu.matmul %46, %47, %cst_20 {dimension_numbers = #tpu.dot_dimension_numbers<[1], [1], [0], [0], [0, 0, 1, 0], [], []>} : vector<8x8xf32>, vector<8x8xf32>, vector<8x8xf32> -> vector<8x8xf32>
    %cst_21 = arith.constant 0.353553385 : f32
    %50 = vector.broadcast %cst_21 : f32 to vector<8x8xf32>
    %51 = arith.mulf %49, %50 : vector<8x8xf32>
    %52 = vector.broadcast %40 : vector<1x8xf32> to vector<8x8xf32>
    %53 = arith.addf %51, %52 : vector<8x8xf32>
    %cst_22 = arith.constant dense<0xFF800000> : vector<8xf32>
    %54 = vector.multi_reduction <maximumf>, %53, %cst_22 [1] : vector<8x8xf32> to vector<8xf32>
    %55 = vector.shape_cast %54 : vector<8xf32> to vector<8x1xf32>
    %56 = vector.broadcast %55 : vector<8x1xf32> to vector<8x8xf32>
    %57 = arith.subf %53, %56 : vector<8x8xf32>
    %58 = math.exp %57 : vector<8x8xf32>
    %cst_23 = arith.constant dense<0.000000e+00> : vector<8xf32>
    %59 = vector.multi_reduction <add>, %58, %cst_23 [1] : vector<8x8xf32> to vector<8xf32>
    %60 = vector.shape_cast %59 : vector<8xf32> to vector<8x1xf32>
    %61 = vector.broadcast %60 : vector<8x1xf32> to vector<8x8xf32>
    %62 = arith.divf %58, %61 : vector<8x8xf32>
    %cst_24 = arith.constant dense<0.000000e+00> : vector<8x8xf32>
    %63 = tpu.matmul %62, %48, %cst_24 {dimension_numbers = #tpu.dot_dimension_numbers<[1], [0], [0], [1], [0, 0, 1, 1], [], []>} : vector<8x8xf32>, vector<8x8xf32>, vector<8x8xf32> -> vector<8x8xf32>
    %64 = vector.extract_strided_slice %45 {offsets = [0, 8], sizes = [8, 8], strides = [1, 1]} : vector<8x96xf32> to vector<8x8xf32>
    %65 = vector.extract_strided_slice %45 {offsets = [0, 40], sizes = [8, 8], strides = [1, 1]} : vector<8x96xf32> to vector<8x8xf32>
    %66 = vector.extract_strided_slice %45 {offsets = [0, 72], sizes = [8, 8], strides = [1, 1]} : vector<8x96xf32> to vector<8x8xf32>
    %cst_25 = arith.constant dense<0.000000e+00> : vector<8x8xf32>
    %67 = tpu.matmul %64, %65, %cst_25 {dimension_numbers = #tpu.dot_dimension_numbers<[1], [1], [0], [0], [0, 0, 1, 0], [], []>} : vector<8x8xf32>, vector<8x8xf32>, vector<8x8xf32> -> vector<8x8xf32>
    %cst_26 = arith.constant 0.353553385 : f32
    %68 = vector.broadcast %cst_26 : f32 to vector<8x8xf32>
    %69 = arith.mulf %67, %68 : vector<8x8xf32>
    %70 = vector.broadcast %40 : vector<1x8xf32> to vector<8x8xf32>
    %71 = arith.addf %69, %70 : vector<8x8xf32>
    %cst_27 = arith.constant dense<0xFF800000> : vector<8xf32>
    %72 = vector.multi_reduction <maximumf>, %71, %cst_27 [1] : vector<8x8xf32> to vector<8xf32>
    %73 = vector.shape_cast %72 : vector<8xf32> to vector<8x1xf32>
    %74 = vector.broadcast %73 : vector<8x1xf32> to vector<8x8xf32>
    %75 = arith.subf %71, %74 : vector<8x8xf32>
    %76 = math.exp %75 : vector<8x8xf32>
    %cst_28 = arith.constant dense<0.000000e+00> : vector<8xf32>
    %77 = vector.multi_reduction <add>, %76, %cst_28 [1] : vector<8x8xf32> to vector<8xf32>
    %78 = vector.shape_cast %77 : vector<8xf32> to vector<8x1xf32>
    %79 = vector.broadcast %78 : vector<8x1xf32> to vector<8x8xf32>
    %80 = arith.divf %76, %79 : vector<8x8xf32>
    %cst_29 = arith.constant dense<0.000000e+00> : vector<8x8xf32>
    %81 = tpu.matmul %80, %66, %cst_29 {dimension_numbers = #tpu.dot_dimension_numbers<[1], [0], [0], [1], [0, 0, 1, 1], [], []>} : vector<8x8xf32>, vector<8x8xf32>, vector<8x8xf32> -> vector<8x8xf32>
    %82 = vector.extract_strided_slice %45 {offsets = [0, 16], sizes = [8, 8], strides = [1, 1]} : vector<8x96xf32> to vector<8x8xf32>
    %83 = vector.extract_strided_slice %45 {offsets = [0, 48], sizes = [8, 8], strides = [1, 1]} : vector<8x96xf32> to vector<8x8xf32>
    %84 = vector.extract_strided_slice %45 {offsets = [0, 80], sizes = [8, 8], strides = [1, 1]} : vector<8x96xf32> to vector<8x8xf32>
    %cst_30 = arith.constant dense<0.000000e+00> : vector<8x8xf32>
    %85 = tpu.matmul %82, %83, %cst_30 {dimension_numbers = #tpu.dot_dimension_numbers<[1], [1], [0], [0], [0, 0, 1, 0], [], []>} : vector<8x8xf32>, vector<8x8xf32>, vector<8x8xf32> -> vector<8x8xf32>
    %cst_31 = arith.constant 0.353553385 : f32
    %86 = vector.broadcast %cst_31 : f32 to vector<8x8xf32>
    %87 = arith.mulf %85, %86 : vector<8x8xf32>
    %88 = vector.broadcast %40 : vector<1x8xf32> to vector<8x8xf32>
    %89 = arith.addf %87, %88 : vector<8x8xf32>
    %cst_32 = arith.constant dense<0xFF800000> : vector<8xf32>
    %90 = vector.multi_reduction <maximumf>, %89, %cst_32 [1] : vector<8x8xf32> to vector<8xf32>
    %91 = vector.shape_cast %90 : vector<8xf32> to vector<8x1xf32>
    %92 = vector.broadcast %91 : vector<8x1xf32> to vector<8x8xf32>
    %93 = arith.subf %89, %92 : vector<8x8xf32>
    %94 = math.exp %93 : vector<8x8xf32>
    %cst_33 = arith.constant dense<0.000000e+00> : vector<8xf32>
    %95 = vector.multi_reduction <add>, %94, %cst_33 [1] : vector<8x8xf32> to vector<8xf32>
    %96 = vector.shape_cast %95 : vector<8xf32> to vector<8x1xf32>
    %97 = vector.broadcast %96 : vector<8x1xf32> to vector<8x8xf32>
    %98 = arith.divf %94, %97 : vector<8x8xf32>
    %cst_34 = arith.constant dense<0.000000e+00> : vector<8x8xf32>
    %99 = tpu.matmul %98, %84, %cst_34 {dimension_numbers = #tpu.dot_dimension_numbers<[1], [0], [0], [1], [0, 0, 1, 1], [], []>} : vector<8x8xf32>, vector<8x8xf32>, vector<8x8xf32> -> vector<8x8xf32>
    %100 = vector.extract_strided_slice %45 {offsets = [0, 24], sizes = [8, 8], strides = [1, 1]} : vector<8x96xf32> to vector<8x8xf32>
    %101 = vector.extract_strided_slice %45 {offsets = [0, 56], sizes = [8, 8], strides = [1, 1]} : vector<8x96xf32> to vector<8x8xf32>
    %102 = vector.extract_strided_slice %45 {offsets = [0, 88], sizes = [8, 8], strides = [1, 1]} : vector<8x96xf32> to vector<8x8xf32>
    %cst_35 = arith.constant dense<0.000000e+00> : vector<8x8xf32>
    %103 = tpu.matmul %100, %101, %cst_35 {dimension_numbers = #tpu.dot_dimension_numbers<[1], [1], [0], [0], [0, 0, 1, 0], [], []>} : vector<8x8xf32>, vector<8x8xf32>, vector<8x8xf32> -> vector<8x8xf32>
    %cst_36 = arith.constant 0.353553385 : f32
    %104 = vector.broadcast %cst_36 : f32 to vector<8x8xf32>
    %105 = arith.mulf %103, %104 : vector<8x8xf32>
    %106 = vector.broadcast %40 : vector<1x8xf32> to vector<8x8xf32>
    %107 = arith.addf %105, %106 : vector<8x8xf32>
    %cst_37 = arith.constant dense<0xFF800000> : vector<8xf32>
    %108 = vector.multi_reduction <maximumf>, %107, %cst_37 [1] : vector<8x8xf32> to vector<8xf32>
    %109 = vector.shape_cast %108 : vector<8xf32> to vector<8x1xf32>
    %110 = vector.broadcast %109 : vector<8x1xf32> to vector<8x8xf32>
    %111 = arith.subf %107, %110 : vector<8x8xf32>
    %112 = math.exp %111 : vector<8x8xf32>
    %cst_38 = arith.constant dense<0.000000e+00> : vector<8xf32>
    %113 = vector.multi_reduction <add>, %112, %cst_38 [1] : vector<8x8xf32> to vector<8xf32>
    %114 = vector.shape_cast %113 : vector<8xf32> to vector<8x1xf32>
    %115 = vector.broadcast %114 : vector<8x1xf32> to vector<8x8xf32>
    %116 = arith.divf %112, %115 : vector<8x8xf32>
    %cst_39 = arith.constant dense<0.000000e+00> : vector<8x8xf32>
    %117 = tpu.matmul %116, %102, %cst_39 {dimension_numbers = #tpu.dot_dimension_numbers<[1], [0], [0], [1], [0, 0, 1, 1], [], []>} : vector<8x8xf32>, vector<8x8xf32>, vector<8x8xf32> -> vector<8x8xf32>
    %118 = tpu.concatenate %63, %81, %99, %117 in 1 : vector<8x8xf32>, vector<8x8xf32>, vector<8x8xf32>, vector<8x8xf32> -> vector<8x32xf32>
    %c184 = arith.constant 184 : index
    %c0_40 = arith.constant 0 : index
    %119 = vector.load %arg3[%c184, %c0_40] : memref<488x128xf32, #tpu.memory_space<vmem>>, vector<32x32xf32>
    %cst_41 = arith.constant dense<0.000000e+00> : vector<8x32xf32>
    %120 = tpu.matmul %118, %119, %cst_41 {dimension_numbers = #tpu.dot_dimension_numbers<[1], [0], [0], [1], [0, 0, 1, 1], [], []>} : vector<8x32xf32>, vector<32x32xf32>, vector<8x32xf32> -> vector<8x32xf32>
    %c313 = arith.constant 313 : index
    %c0_42 = arith.constant 0 : index
    %121 = vector.load %arg3[%c313, %c0_42] : memref<488x128xf32, #tpu.memory_space<vmem>>, vector<1x32xf32>
    %122 = vector.broadcast %121 : vector<1x32xf32> to vector<8x32xf32>
    %123 = arith.addf %120, %122 : vector<8x32xf32>
    %124 = arith.addf %123, %34 : vector<8x32xf32>
    %c314 = arith.constant 314 : index
    %c0_43 = arith.constant 0 : index
    %125 = vector.load %arg3[%c314, %c0_43] : memref<488x128xf32, #tpu.memory_space<vmem>>, vector<1x32xf32>
    %c315 = arith.constant 315 : index
    %c0_44 = arith.constant 0 : index
    %126 = vector.load %arg3[%c315, %c0_44] : memref<488x128xf32, #tpu.memory_space<vmem>>, vector<1x32xf32>
    %cst_45 = arith.constant dense<0.000000e+00> : vector<8xf32>
    %127 = vector.multi_reduction <add>, %124, %cst_45 [1] : vector<8x32xf32> to vector<8xf32>
    %128 = vector.shape_cast %127 : vector<8xf32> to vector<8x1xf32>
    %cst_46 = arith.constant 3.200000e+01 : f32
    %129 = vector.broadcast %cst_46 : f32 to vector<8x1xf32>
    %130 = arith.divf %128, %129 : vector<8x1xf32>
    %131 = vector.broadcast %130 : vector<8x1xf32> to vector<8x32xf32>
    %132 = arith.subf %124, %131 : vector<8x32xf32>
    %133 = arith.mulf %132, %132 : vector<8x32xf32>
    %cst_47 = arith.constant dense<0.000000e+00> : vector<8xf32>
    %134 = vector.multi_reduction <add>, %133, %cst_47 [1] : vector<8x32xf32> to vector<8xf32>
    %135 = vector.shape_cast %134 : vector<8xf32> to vector<8x1xf32>
    %cst_48 = arith.constant 3.200000e+01 : f32
    %136 = vector.broadcast %cst_48 : f32 to vector<8x1xf32>
    %137 = arith.divf %135, %136 : vector<8x1xf32>
    %138 = vector.broadcast %130 : vector<8x1xf32> to vector<8x32xf32>
    %139 = arith.subf %124, %138 : vector<8x32xf32>
    %cst_49 = arith.constant 9.99999996E-13 : f32
    %140 = vector.broadcast %cst_49 : f32 to vector<8x1xf32>
    %141 = arith.addf %137, %140 : vector<8x1xf32>
    %142 = math.rsqrt %141 : vector<8x1xf32>
    %143 = vector.broadcast %142 : vector<8x1xf32> to vector<8x32xf32>
    %144 = arith.mulf %139, %143 : vector<8x32xf32>
    %145 = vector.broadcast %125 : vector<1x32xf32> to vector<8x32xf32>
    %146 = arith.mulf %144, %145 : vector<8x32xf32>
    %147 = vector.broadcast %126 : vector<1x32xf32> to vector<8x32xf32>
    %148 = arith.addf %146, %147 : vector<8x32xf32>
    %c216 = arith.constant 216 : index
    %c0_50 = arith.constant 0 : index
    %149 = vector.load %arg3[%c216, %c0_50] : memref<488x128xf32, #tpu.memory_space<vmem>>, vector<32x64xf32>
    %cst_51 = arith.constant dense<0.000000e+00> : vector<8x64xf32>
    %150 = tpu.matmul %148, %149, %cst_51 {dimension_numbers = #tpu.dot_dimension_numbers<[1], [0], [0], [1], [0, 0, 1, 1], [], []>} : vector<8x32xf32>, vector<32x64xf32>, vector<8x64xf32> -> vector<8x64xf32>
    %c316 = arith.constant 316 : index
    %c0_52 = arith.constant 0 : index
    %151 = vector.load %arg3[%c316, %c0_52] : memref<488x128xf32, #tpu.memory_space<vmem>>, vector<1x64xf32>
    %152 = vector.broadcast %151 : vector<1x64xf32> to vector<8x64xf32>
    %153 = arith.addf %150, %152 : vector<8x64xf32>
    %cst_53 = arith.constant 5.000000e-01 : f32
    %154 = vector.broadcast %cst_53 : f32 to vector<8x64xf32>
    %155 = arith.mulf %154, %153 : vector<8x64xf32>
    %cst_54 = arith.constant 4.471500e-02 : f32
    %156 = vector.broadcast %cst_54 : f32 to vector<8x64xf32>
    %157 = arith.mulf %156, %153 : vector<8x64xf32>
    %158 = arith.mulf %157, %153 : vector<8x64xf32>
    %159 = arith.mulf %158, %153 : vector<8x64xf32>
    %160 = arith.addf %153, %159 : vector<8x64xf32>
    %cst_55 = arith.constant 0.797884583 : f32
    %161 = vector.broadcast %cst_55 : f32 to vector<8x64xf32>
    %162 = arith.mulf %161, %160 : vector<8x64xf32>
    %163 = math.tanh %162 : vector<8x64xf32>
    %cst_56 = arith.constant 1.000000e+00 : f32
    %164 = vector.broadcast %cst_56 : f32 to vector<8x64xf32>
    %165 = arith.addf %164, %163 : vector<8x64xf32>
    %166 = arith.mulf %155, %165 : vector<8x64xf32>
    %c248 = arith.constant 248 : index
    %c0_57 = arith.constant 0 : index
    %167 = vector.load %arg3[%c248, %c0_57] : memref<488x128xf32, #tpu.memory_space<vmem>>, vector<64x32xf32>
    %cst_58 = arith.constant dense<0.000000e+00> : vector<8x32xf32>
    %168 = tpu.matmul %166, %167, %cst_58 {dimension_numbers = #tpu.dot_dimension_numbers<[1], [0], [0], [1], [0, 0, 1, 1], [], []>} : vector<8x64xf32>, vector<64x32xf32>, vector<8x32xf32> -> vector<8x32xf32>
    %c317 = arith.constant 317 : index
    %c0_59 = arith.constant 0 : index
    %169 = vector.load %arg3[%c317, %c0_59] : memref<488x128xf32, #tpu.memory_space<vmem>>, vector<1x32xf32>
    %170 = vector.broadcast %169 : vector<1x32xf32> to vector<8x32xf32>
    %171 = arith.addf %168, %170 : vector<8x32xf32>
    %172 = arith.addf %171, %148 : vector<8x32xf32>
    %c318 = arith.constant 318 : index
    %c0_60 = arith.constant 0 : index
    %173 = vector.load %arg3[%c318, %c0_60] : memref<488x128xf32, #tpu.memory_space<vmem>>, vector<1x32xf32>
    %c319 = arith.constant 319 : index
    %c0_61 = arith.constant 0 : index
    %174 = vector.load %arg3[%c319, %c0_61] : memref<488x128xf32, #tpu.memory_space<vmem>>, vector<1x32xf32>
    %cst_62 = arith.constant dense<0.000000e+00> : vector<8xf32>
    %175 = vector.multi_reduction <add>, %172, %cst_62 [1] : vector<8x32xf32> to vector<8xf32>
    %176 = vector.shape_cast %175 : vector<8xf32> to vector<8x1xf32>
    %cst_63 = arith.constant 3.200000e+01 : f32
    %177 = vector.broadcast %cst_63 : f32 to vector<8x1xf32>
    %178 = arith.divf %176, %177 : vector<8x1xf32>
    %179 = vector.broadcast %178 : vector<8x1xf32> to vector<8x32xf32>
    %180 = arith.subf %172, %179 : vector<8x32xf32>
    %181 = arith.mulf %180, %180 : vector<8x32xf32>
    %cst_64 = arith.constant dense<0.000000e+00> : vector<8xf32>
    %182 = vector.multi_reduction <add>, %181, %cst_64 [1] : vector<8x32xf32> to vector<8xf32>
    %183 = vector.shape_cast %182 : vector<8xf32> to vector<8x1xf32>
    %cst_65 = arith.constant 3.200000e+01 : f32
    %184 = vector.broadcast %cst_65 : f32 to vector<8x1xf32>
    %185 = arith.divf %183, %184 : vector<8x1xf32>
    %186 = vector.broadcast %178 : vector<8x1xf32> to vector<8x32xf32>
    %187 = arith.subf %172, %186 : vector<8x32xf32>
    %cst_66 = arith.constant 9.99999996E-13 : f32
    %188 = vector.broadcast %cst_66 : f32 to vector<8x1xf32>
    %189 = arith.addf %185, %188 : vector<8x1xf32>
    %190 = math.rsqrt %189 : vector<8x1xf32>
    %191 = vector.broadcast %190 : vector<8x1xf32> to vector<8x32xf32>
    %192 = arith.mulf %187, %191 : vector<8x32xf32>
    %193 = vector.broadcast %173 : vector<1x32xf32> to vector<8x32xf32>
    %194 = arith.mulf %192, %193 : vector<8x32xf32>
    %195 = vector.broadcast %174 : vector<1x32xf32> to vector<8x32xf32>
    %196 = arith.addf %194, %195 : vector<8x32xf32>
    %c320 = arith.constant 320 : index
    %c0_67 = arith.constant 0 : index
    %197 = vector.load %arg3[%c320, %c0_67] : memref<488x128xf32, #tpu.memory_space<vmem>>, vector<32x96xf32>
    %cst_68 = arith.constant dense<0.000000e+00> : vector<8x96xf32>
    %198 = tpu.matmul %196, %197, %cst_68 {dimension_numbers = #tpu.dot_dimension_numbers<[1], [0], [0], [1], [0, 0, 1, 1], [], []>} : vector<8x32xf32>, vector<32x96xf32>, vector<8x96xf32> -> vector<8x96xf32>
    %c480 = arith.constant 480 : index
    %c0_69 = arith.constant 0 : index
    %199 = vector.load %arg3[%c480, %c0_69] : memref<488x128xf32, #tpu.memory_space<vmem>>, vector<1x96xf32>
    %200 = vector.broadcast %199 : vector<1x96xf32> to vector<8x96xf32>
    %201 = arith.addf %198, %200 : vector<8x96xf32>
    %202 = vector.extract_strided_slice %201 {offsets = [0, 0], sizes = [8, 8], strides = [1, 1]} : vector<8x96xf32> to vector<8x8xf32>
    %203 = vector.extract_strided_slice %201 {offsets = [0, 32], sizes = [8, 8], strides = [1, 1]} : vector<8x96xf32> to vector<8x8xf32>
    %204 = vector.extract_strided_slice %201 {offsets = [0, 64], sizes = [8, 8], strides = [1, 1]} : vector<8x96xf32> to vector<8x8xf32>
    %cst_70 = arith.constant dense<0.000000e+00> : vector<8x8xf32>
    %205 = tpu.matmul %202, %203, %cst_70 {dimension_numbers = #tpu.dot_dimension_numbers<[1], [1], [0], [0], [0, 0, 1, 0], [], []>} : vector<8x8xf32>, vector<8x8xf32>, vector<8x8xf32> -> vector<8x8xf32>
    %cst_71 = arith.constant 0.353553385 : f32
    %206 = vector.broadcast %cst_71 : f32 to vector<8x8xf32>
    %207 = arith.mulf %205, %206 : vector<8x8xf32>
    %208 = vector.broadcast %40 : vector<1x8xf32> to vector<8x8xf32>
    %209 = arith.addf %207, %208 : vector<8x8xf32>
    %cst_72 = arith.constant dense<0xFF800000> : vector<8xf32>
    %210 = vector.multi_reduction <maximumf>, %209, %cst_72 [1] : vector<8x8xf32> to vector<8xf32>
    %211 = vector.shape_cast %210 : vector<8xf32> to vector<8x1xf32>
    %212 = vector.broadcast %211 : vector<8x1xf32> to vector<8x8xf32>
    %213 = arith.subf %209, %212 : vector<8x8xf32>
    %214 = math.exp %213 : vector<8x8xf32>
    %cst_73 = arith.constant dense<0.000000e+00> : vector<8xf32>
    %215 = vector.multi_reduction <add>, %214, %cst_73 [1] : vector<8x8xf32> to vector<8xf32>
    %216 = vector.shape_cast %215 : vector<8xf32> to vector<8x1xf32>
    %217 = vector.broadcast %216 : vector<8x1xf32> to vector<8x8xf32>
    %218 = arith.divf %214, %217 : vector<8x8xf32>
    %cst_74 = arith.constant dense<0.000000e+00> : vector<8x8xf32>
    %219 = tpu.matmul %218, %204, %cst_74 {dimension_numbers = #tpu.dot_dimension_numbers<[1], [0], [0], [1], [0, 0, 1, 1], [], []>} : vector<8x8xf32>, vector<8x8xf32>, vector<8x8xf32> -> vector<8x8xf32>
    %220 = vector.extract_strided_slice %201 {offsets = [0, 8], sizes = [8, 8], strides = [1, 1]} : vector<8x96xf32> to vector<8x8xf32>
    %221 = vector.extract_strided_slice %201 {offsets = [0, 40], sizes = [8, 8], strides = [1, 1]} : vector<8x96xf32> to vector<8x8xf32>
    %222 = vector.extract_strided_slice %201 {offsets = [0, 72], sizes = [8, 8], strides = [1, 1]} : vector<8x96xf32> to vector<8x8xf32>
    %cst_75 = arith.constant dense<0.000000e+00> : vector<8x8xf32>
    %223 = tpu.matmul %220, %221, %cst_75 {dimension_numbers = #tpu.dot_dimension_numbers<[1], [1], [0], [0], [0, 0, 1, 0], [], []>} : vector<8x8xf32>, vector<8x8xf32>, vector<8x8xf32> -> vector<8x8xf32>
    %cst_76 = arith.constant 0.353553385 : f32
    %224 = vector.broadcast %cst_76 : f32 to vector<8x8xf32>
    %225 = arith.mulf %223, %224 : vector<8x8xf32>
    %226 = vector.broadcast %40 : vector<1x8xf32> to vector<8x8xf32>
    %227 = arith.addf %225, %226 : vector<8x8xf32>
    %cst_77 = arith.constant dense<0xFF800000> : vector<8xf32>
    %228 = vector.multi_reduction <maximumf>, %227, %cst_77 [1] : vector<8x8xf32> to vector<8xf32>
    %229 = vector.shape_cast %228 : vector<8xf32> to vector<8x1xf32>
    %230 = vector.broadcast %229 : vector<8x1xf32> to vector<8x8xf32>
    %231 = arith.subf %227, %230 : vector<8x8xf32>
    %232 = math.exp %231 : vector<8x8xf32>
    %cst_78 = arith.constant dense<0.000000e+00> : vector<8xf32>
    %233 = vector.multi_reduction <add>, %232, %cst_78 [1] : vector<8x8xf32> to vector<8xf32>
    %234 = vector.shape_cast %233 : vector<8xf32> to vector<8x1xf32>
    %235 = vector.broadcast %234 : vector<8x1xf32> to vector<8x8xf32>
    %236 = arith.divf %232, %235 : vector<8x8xf32>
    %cst_79 = arith.constant dense<0.000000e+00> : vector<8x8xf32>
    %237 = tpu.matmul %236, %222, %cst_79 {dimension_numbers = #tpu.dot_dimension_numbers<[1], [0], [0], [1], [0, 0, 1, 1], [], []>} : vector<8x8xf32>, vector<8x8xf32>, vector<8x8xf32> -> vector<8x8xf32>
    %238 = vector.extract_strided_slice %201 {offsets = [0, 16], sizes = [8, 8], strides = [1, 1]} : vector<8x96xf32> to vector<8x8xf32>
    %239 = vector.extract_strided_slice %201 {offsets = [0, 48], sizes = [8, 8], strides = [1, 1]} : vector<8x96xf32> to vector<8x8xf32>
    %240 = vector.extract_strided_slice %201 {offsets = [0, 80], sizes = [8, 8], strides = [1, 1]} : vector<8x96xf32> to vector<8x8xf32>
    %cst_80 = arith.constant dense<0.000000e+00> : vector<8x8xf32>
    %241 = tpu.matmul %238, %239, %cst_80 {dimension_numbers = #tpu.dot_dimension_numbers<[1], [1], [0], [0], [0, 0, 1, 0], [], []>} : vector<8x8xf32>, vector<8x8xf32>, vector<8x8xf32> -> vector<8x8xf32>
    %cst_81 = arith.constant 0.353553385 : f32
    %242 = vector.broadcast %cst_81 : f32 to vector<8x8xf32>
    %243 = arith.mulf %241, %242 : vector<8x8xf32>
    %244 = vector.broadcast %40 : vector<1x8xf32> to vector<8x8xf32>
    %245 = arith.addf %243, %244 : vector<8x8xf32>
    %cst_82 = arith.constant dense<0xFF800000> : vector<8xf32>
    %246 = vector.multi_reduction <maximumf>, %245, %cst_82 [1] : vector<8x8xf32> to vector<8xf32>
    %247 = vector.shape_cast %246 : vector<8xf32> to vector<8x1xf32>
    %248 = vector.broadcast %247 : vector<8x1xf32> to vector<8x8xf32>
    %249 = arith.subf %245, %248 : vector<8x8xf32>
    %250 = math.exp %249 : vector<8x8xf32>
    %cst_83 = arith.constant dense<0.000000e+00> : vector<8xf32>
    %251 = vector.multi_reduction <add>, %250, %cst_83 [1] : vector<8x8xf32> to vector<8xf32>
    %252 = vector.shape_cast %251 : vector<8xf32> to vector<8x1xf32>
    %253 = vector.broadcast %252 : vector<8x1xf32> to vector<8x8xf32>
    %254 = arith.divf %250, %253 : vector<8x8xf32>
    %cst_84 = arith.constant dense<0.000000e+00> : vector<8x8xf32>
    %255 = tpu.matmul %254, %240, %cst_84 {dimension_numbers = #tpu.dot_dimension_numbers<[1], [0], [0], [1], [0, 0, 1, 1], [], []>} : vector<8x8xf32>, vector<8x8xf32>, vector<8x8xf32> -> vector<8x8xf32>
    %256 = vector.extract_strided_slice %201 {offsets = [0, 24], sizes = [8, 8], strides = [1, 1]} : vector<8x96xf32> to vector<8x8xf32>
    %257 = vector.extract_strided_slice %201 {offsets = [0, 56], sizes = [8, 8], strides = [1, 1]} : vector<8x96xf32> to vector<8x8xf32>
    %258 = vector.extract_strided_slice %201 {offsets = [0, 88], sizes = [8, 8], strides = [1, 1]} : vector<8x96xf32> to vector<8x8xf32>
    %cst_85 = arith.constant dense<0.000000e+00> : vector<8x8xf32>
    %259 = tpu.matmul %256, %257, %cst_85 {dimension_numbers = #tpu.dot_dimension_numbers<[1], [1], [0], [0], [0, 0, 1, 0], [], []>} : vector<8x8xf32>, vector<8x8xf32>, vector<8x8xf32> -> vector<8x8xf32>
    %cst_86 = arith.constant 0.353553385 : f32
    %260 = vector.broadcast %cst_86 : f32 to vector<8x8xf32>
    %261 = arith.mulf %259, %260 : vector<8x8xf32>
    %262 = vector.broadcast %40 : vector<1x8xf32> to vector<8x8xf32>
    %263 = arith.addf %261, %262 : vector<8x8xf32>
    %cst_87 = arith.constant dense<0xFF800000> : vector<8xf32>
    %264 = vector.multi_reduction <maximumf>, %263, %cst_87 [1] : vector<8x8xf32> to vector<8xf32>
    %265 = vector.shape_cast %264 : vector<8xf32> to vector<8x1xf32>
    %266 = vector.broadcast %265 : vector<8x1xf32> to vector<8x8xf32>
    %267 = arith.subf %263, %266 : vector<8x8xf32>
    %268 = math.exp %267 : vector<8x8xf32>
    %cst_88 = arith.constant dense<0.000000e+00> : vector<8xf32>
    %269 = vector.multi_reduction <add>, %268, %cst_88 [1] : vector<8x8xf32> to vector<8xf32>
    %270 = vector.shape_cast %269 : vector<8xf32> to vector<8x1xf32>
    %271 = vector.broadcast %270 : vector<8x1xf32> to vector<8x8xf32>
    %272 = arith.divf %268, %271 : vector<8x8xf32>
    %cst_89 = arith.constant dense<0.000000e+00> : vector<8x8xf32>
    %273 = tpu.matmul %272, %258, %cst_89 {dimension_numbers = #tpu.dot_dimension_numbers<[1], [0], [0], [1], [0, 0, 1, 1], [], []>} : vector<8x8xf32>, vector<8x8xf32>, vector<8x8xf32> -> vector<8x8xf32>
    %274 = tpu.concatenate %219, %237, %255, %273 in 1 : vector<8x8xf32>, vector<8x8xf32>, vector<8x8xf32>, vector<8x8xf32> -> vector<8x32xf32>
    %c352 = arith.constant 352 : index
    %c0_90 = arith.constant 0 : index
    %275 = vector.load %arg3[%c352, %c0_90] : memref<488x128xf32, #tpu.memory_space<vmem>>, vector<32x32xf32>
    %cst_91 = arith.constant dense<0.000000e+00> : vector<8x32xf32>
    %276 = tpu.matmul %274, %275, %cst_91 {dimension_numbers = #tpu.dot_dimension_numbers<[1], [0], [0], [1], [0, 0, 1, 1], [], []>} : vector<8x32xf32>, vector<32x32xf32>, vector<8x32xf32> -> vector<8x32xf32>
    %c481 = arith.constant 481 : index
    %c0_92 = arith.constant 0 : index
    %277 = vector.load %arg3[%c481, %c0_92] : memref<488x128xf32, #tpu.memory_space<vmem>>, vector<1x32xf32>
    %278 = vector.broadcast %277 : vector<1x32xf32> to vector<8x32xf32>
    %279 = arith.addf %276, %278 : vector<8x32xf32>
    %280 = arith.addf %279, %196 : vector<8x32xf32>
    %c482 = arith.constant 482 : index
    %c0_93 = arith.constant 0 : index
    %281 = vector.load %arg3[%c482, %c0_93] : memref<488x128xf32, #tpu.memory_space<vmem>>, vector<1x32xf32>
    %c483 = arith.constant 483 : index
    %c0_94 = arith.constant 0 : index
    %282 = vector.load %arg3[%c483, %c0_94] : memref<488x128xf32, #tpu.memory_space<vmem>>, vector<1x32xf32>
    %cst_95 = arith.constant dense<0.000000e+00> : vector<8xf32>
    %283 = vector.multi_reduction <add>, %280, %cst_95 [1] : vector<8x32xf32> to vector<8xf32>
    %284 = vector.shape_cast %283 : vector<8xf32> to vector<8x1xf32>
    %cst_96 = arith.constant 3.200000e+01 : f32
    %285 = vector.broadcast %cst_96 : f32 to vector<8x1xf32>
    %286 = arith.divf %284, %285 : vector<8x1xf32>
    %287 = vector.broadcast %286 : vector<8x1xf32> to vector<8x32xf32>
    %288 = arith.subf %280, %287 : vector<8x32xf32>
    %289 = arith.mulf %288, %288 : vector<8x32xf32>
    %cst_97 = arith.constant dense<0.000000e+00> : vector<8xf32>
    %290 = vector.multi_reduction <add>, %289, %cst_97 [1] : vector<8x32xf32> to vector<8xf32>
    %291 = vector.shape_cast %290 : vector<8xf32> to vector<8x1xf32>
    %cst_98 = arith.constant 3.200000e+01 : f32
    %292 = vector.broadcast %cst_98 : f32 to vector<8x1xf32>
    %293 = arith.divf %291, %292 : vector<8x1xf32>
    %294 = vector.broadcast %286 : vector<8x1xf32> to vector<8x32xf32>
    %295 = arith.subf %280, %294 : vector<8x32xf32>
    %cst_99 = arith.constant 9.99999996E-13 : f32
    %296 = vector.broadcast %cst_99 : f32 to vector<8x1xf32>
    %297 = arith.addf %293, %296 : vector<8x1xf32>
    %298 = math.rsqrt %297 : vector<8x1xf32>
    %299 = vector.broadcast %298 : vector<8x1xf32> to vector<8x32xf32>
    %300 = arith.mulf %295, %299 : vector<8x32xf32>
    %301 = vector.broadcast %281 : vector<1x32xf32> to vector<8x32xf32>
    %302 = arith.mulf %300, %301 : vector<8x32xf32>
    %303 = vector.broadcast %282 : vector<1x32xf32> to vector<8x32xf32>
    %304 = arith.addf %302, %303 : vector<8x32xf32>
    %c384 = arith.constant 384 : index
    %c0_100 = arith.constant 0 : index
    %305 = vector.load %arg3[%c384, %c0_100] : memref<488x128xf32, #tpu.memory_space<vmem>>, vector<32x64xf32>
    %cst_101 = arith.constant dense<0.000000e+00> : vector<8x64xf32>
    %306 = tpu.matmul %304, %305, %cst_101 {dimension_numbers = #tpu.dot_dimension_numbers<[1], [0], [0], [1], [0, 0, 1, 1], [], []>} : vector<8x32xf32>, vector<32x64xf32>, vector<8x64xf32> -> vector<8x64xf32>
    %c484 = arith.constant 484 : index
    %c0_102 = arith.constant 0 : index
    %307 = vector.load %arg3[%c484, %c0_102] : memref<488x128xf32, #tpu.memory_space<vmem>>, vector<1x64xf32>
    %308 = vector.broadcast %307 : vector<1x64xf32> to vector<8x64xf32>
    %309 = arith.addf %306, %308 : vector<8x64xf32>
    %cst_103 = arith.constant 5.000000e-01 : f32
    %310 = vector.broadcast %cst_103 : f32 to vector<8x64xf32>
    %311 = arith.mulf %310, %309 : vector<8x64xf32>
    %cst_104 = arith.constant 4.471500e-02 : f32
    %312 = vector.broadcast %cst_104 : f32 to vector<8x64xf32>
    %313 = arith.mulf %312, %309 : vector<8x64xf32>
    %314 = arith.mulf %313, %309 : vector<8x64xf32>
    %315 = arith.mulf %314, %309 : vector<8x64xf32>
    %316 = arith.addf %309, %315 : vector<8x64xf32>
    %cst_105 = arith.constant 0.797884583 : f32
    %317 = vector.broadcast %cst_105 : f32 to vector<8x64xf32>
    %318 = arith.mulf %317, %316 : vector<8x64xf32>
    %319 = math.tanh %318 : vector<8x64xf32>
    %cst_106 = arith.constant 1.000000e+00 : f32
    %320 = vector.broadcast %cst_106 : f32 to vector<8x64xf32>
    %321 = arith.addf %320, %319 : vector<8x64xf32>
    %322 = arith.mulf %311, %321 : vector<8x64xf32>
    %c416 = arith.constant 416 : index
    %c0_107 = arith.constant 0 : index
    %323 = vector.load %arg3[%c416, %c0_107] : memref<488x128xf32, #tpu.memory_space<vmem>>, vector<64x32xf32>
    %cst_108 = arith.constant dense<0.000000e+00> : vector<8x32xf32>
    %324 = tpu.matmul %322, %323, %cst_108 {dimension_numbers = #tpu.dot_dimension_numbers<[1], [0], [0], [1], [0, 0, 1, 1], [], []>} : vector<8x64xf32>, vector<64x32xf32>, vector<8x32xf32> -> vector<8x32xf32>
    %c485 = arith.constant 485 : index
    %c0_109 = arith.constant 0 : index
    %325 = vector.load %arg3[%c485, %c0_109] : memref<488x128xf32, #tpu.memory_space<vmem>>, vector<1x32xf32>
    %326 = vector.broadcast %325 : vector<1x32xf32> to vector<8x32xf32>
    %327 = arith.addf %324, %326 : vector<8x32xf32>
    %328 = arith.addf %327, %304 : vector<8x32xf32>
    %c486 = arith.constant 486 : index
    %c0_110 = arith.constant 0 : index
    %329 = vector.load %arg3[%c486, %c0_110] : memref<488x128xf32, #tpu.memory_space<vmem>>, vector<1x32xf32>
    %c487 = arith.constant 487 : index
    %c0_111 = arith.constant 0 : index
    %330 = vector.load %arg3[%c487, %c0_111] : memref<488x128xf32, #tpu.memory_space<vmem>>, vector<1x32xf32>
    %cst_112 = arith.constant dense<0.000000e+00> : vector<8xf32>
    %331 = vector.multi_reduction <add>, %328, %cst_112 [1] : vector<8x32xf32> to vector<8xf32>
    %332 = vector.shape_cast %331 : vector<8xf32> to vector<8x1xf32>
    %cst_113 = arith.constant 3.200000e+01 : f32
    %333 = vector.broadcast %cst_113 : f32 to vector<8x1xf32>
    %334 = arith.divf %332, %333 : vector<8x1xf32>
    %335 = vector.broadcast %334 : vector<8x1xf32> to vector<8x32xf32>
    %336 = arith.subf %328, %335 : vector<8x32xf32>
    %337 = arith.mulf %336, %336 : vector<8x32xf32>
    %cst_114 = arith.constant dense<0.000000e+00> : vector<8xf32>
    %338 = vector.multi_reduction <add>, %337, %cst_114 [1] : vector<8x32xf32> to vector<8xf32>
    %339 = vector.shape_cast %338 : vector<8xf32> to vector<8x1xf32>
    %cst_115 = arith.constant 3.200000e+01 : f32
    %340 = vector.broadcast %cst_115 : f32 to vector<8x1xf32>
    %341 = arith.divf %339, %340 : vector<8x1xf32>
    %342 = vector.broadcast %334 : vector<8x1xf32> to vector<8x32xf32>
    %343 = arith.subf %328, %342 : vector<8x32xf32>
    %cst_116 = arith.constant 9.99999996E-13 : f32
    %344 = vector.broadcast %cst_116 : f32 to vector<8x1xf32>
    %345 = arith.addf %341, %344 : vector<8x1xf32>
    %346 = math.rsqrt %345 : vector<8x1xf32>
    %347 = vector.broadcast %346 : vector<8x1xf32> to vector<8x32xf32>
    %348 = arith.mulf %343, %347 : vector<8x32xf32>
    %349 = vector.broadcast %329 : vector<1x32xf32> to vector<8x32xf32>
    %350 = arith.mulf %348, %349 : vector<8x32xf32>
    %351 = vector.broadcast %330 : vector<1x32xf32> to vector<8x32xf32>
    %352 = arith.addf %350, %351 : vector<8x32xf32>
    %353 = vector.extract_strided_slice %352 {offsets = [0, 0], sizes = [1, 32], strides = [1, 1]} : vector<8x32xf32> to vector<1x32xf32>
    %c80 = arith.constant 80 : index
    %c0_117 = arith.constant 0 : index
    %354 = vector.load %arg3[%c80, %c0_117] : memref<488x128xf32, #tpu.memory_space<vmem>>, vector<32x32xf32>
    %cst_118 = arith.constant dense<0.000000e+00> : vector<1x32xf32>
    %355 = tpu.matmul %353, %354, %cst_118 {dimension_numbers = #tpu.dot_dimension_numbers<[1], [0], [0], [1], [0, 0, 1, 1], [], []>} : vector<1x32xf32>, vector<32x32xf32>, vector<1x32xf32> -> vector<1x32xf32>
    %c146 = arith.constant 146 : index
    %c0_119 = arith.constant 0 : index
    %356 = vector.load %arg3[%c146, %c0_119] : memref<488x128xf32, #tpu.memory_space<vmem>>, vector<1x32xf32>
    %357 = arith.addf %355, %356 : vector<1x32xf32>
    %358 = math.tanh %357 : vector<1x32xf32>
    %c112 = arith.constant 112 : index
    %c0_120 = arith.constant 0 : index
    %359 = vector.load %arg3[%c112, %c0_120] : memref<488x128xf32, #tpu.memory_space<vmem>>, vector<32x128xf32>
    %cst_121 = arith.constant dense<0.000000e+00> : vector<1x128xf32>
    %360 = tpu.matmul %358, %359, %cst_121 {dimension_numbers = #tpu.dot_dimension_numbers<[1], [0], [0], [1], [0, 0, 1, 1], [], []>} : vector<1x32xf32>, vector<32x128xf32>, vector<1x128xf32> -> vector<1x128xf32>
    %c147 = arith.constant 147 : index
    %c0_122 = arith.constant 0 : index
    %361 = vector.load %arg3[%c147, %c0_122] : memref<488x128xf32, #tpu.memory_space<vmem>>, vector<1x128xf32>
    %362 = arith.addf %360, %361 : vector<1x128xf32>
    %c0_123 = arith.constant 0 : index
    %c0_124 = arith.constant 0 : index
    %c0_125 = arith.constant 0 : index
    %363 = vector.load %arg4[%c0_123, %c0_124, %c0_125] : memref<1x1x128xf32, #tpu.memory_space<vmem>>, vector<1x1x128xf32>
    %364 = vector.shape_cast %363 : vector<1x1x128xf32> to vector<1x128xf32>
    %365 = vector.shape_cast %362 : vector<1x128xf32> to vector<1x1x128xf32>
    tpu.vector_store %arg4[%c0_123, %c0_124, %c0_125], %365 {strides = array<i32>} : memref<1x1x128xf32, #tpu.memory_space<vmem>>, vector<1x1x128xf32>,
    return
  }
  func.func @transform_0(%arg0: i32) -> (i32, i32, i32) {
    %c0_i32 = arith.constant 0 : i32
    %c0_i32_0 = arith.constant 0 : i32
    %c0_i32_1 = arith.constant 0 : i32
    return %arg0, %c0_i32, %c0_i32_0 : i32, i32, i32
  }
  func.func @transform_1(%arg0: i32) -> (i32, i32, i32) {
    %c0_i32 = arith.constant 0 : i32
    %c0_i32_0 = arith.constant 0 : i32
    %c0_i32_1 = arith.constant 0 : i32
    return %arg0, %c0_i32, %c0_i32_0 : i32, i32, i32
  }
  func.func @transform_2(%arg0: i32) -> (i32, i32) {
    %c0_i32 = arith.constant 0 : i32
    %c0_i32_0 = arith.constant 0 : i32
    %c0_i32_1 = arith.constant 0 : i32
    return %c0_i32, %c0_i32_0 : i32, i32
  }
  func.func @transform_3(%arg0: i32) -> (i32, i32, i32) {
    %c0_i32 = arith.constant 0 : i32
    %c0_i32_0 = arith.constant 0 : i32
    %c0_i32_1 = arith.constant 0 : i32
    return %arg0, %c0_i32, %c0_i32_0 : i32, i32, i32
  }
}

</mosaic_0001>

<bundles_post_ra>
// kernel: bert_multitask_forward.1
= control target key start
LH: loop header
LB: loop body
LE: loop exit
PB: predicated region body
PF: predicated region fallthrough
CT: control target
= control target key end

     0   :  { %8 = vsyncpa [#allocation3], 0  ;;  %s3341_s12 = smov 0   ;;  %s3647_s0 = inlined_call_operand.vmem [shape: s32[2,8,1], index: 0, kind: input, shape index: {}]   ;;  %s3648_s1 = inlined_call_operand.vmem [shape: f32[2,1,8], index: 1, kind: input, shape index: {}]   ;;  %s3649_s2 = inlined_call_operand.hbm [shape: f32[488,128], index: 2, kind: input, shape index: {}]   ;;  %s3650_s3 = inlined_call_operand.vmem [shape: f32[2,1,128], index: 3, kind: output, shape index: {}]  }
   0x1 LB: > { %s3347_s13 = sadd.s32 4294967295, %s3298_s12   ;;  %p2702_p0 = scmp.ge.s32.totalorder %s3298_s12, 1  ;;  %s3298_s12 = sphi %s3341_s12, %s14_s12  }
   0x2   : > { %p118_p1 = scmp.lt.s32.totalorder %s3298_s12, 3  ;;  %s3300_s14 = smov [#allocation2]  }
   0x3   : > { %s130_s15 = sshll.u32 %s3300_s14, 4  ;;  %p3651_p3 = scmp.eq.s32.totalorder %s3347_s13, 0  ;;  %s131_s15 = int_to_ptr.vmem [resolvable:$true] %s130_s15 }
   0x4   : > { %p3351_p2 = pnand %p2702_p0, %p118_p1  ;;  %s3260_s20 = scalar_lea.hbm %s3649_s2, 7808 }
   0x5   : > { %p3261_p6 = scmp.ne.s32.totalorder %s3649_s2, %s3260_s20  ;;  %p3267_p10 = scmp.lt.u32.totalorder %s3260_s20, %s3649_s2 }
   0x6   : > { %s3653_s16 = scalar_select %p3351_p2, 1, 0 }
   0x7   : > { %p3176_p4 = pneg %p3351_p2 }
   0x9   : > { %p3360_p5 = pnand %p3651_p3, %p3176_p4 }
   0xb   : > { %p3262_p7 = pneg %p3360_p5 }
   0xd   : > { %p3263_p8 = pnand %p3262_p7, %p3261_p6 }
   0xf   : > { %p3264_p9 = pneg %p3263_p8 }
  0x11   : > { %p3269_p11 = pnand %p3267_p10, %p3264_p9 }
  0x13   : > { %3272 = shalt.err (!%p3269_p11)
}
  0x14   : > { %s3273_s25 = scalar_lea.vmem %s131_s15, 7808  ;;  %p3281_p1 = scmp.lt.s32.totalorder %s131_s15, %s131_s15 }
  0x15   : > { %p3274_p12 = scmp.ne.s32.totalorder %s131_s15, %s3273_s25  ;;  %p3282_p4 = scmp.lt.s32.totalorder %s3273_s25, %s3273_s25 }
  0x17   : > { %p3276_p13 = pnand %p3274_p12, %p3262_p7  ;;  %p3283_p3 = por %p3282_p4, %p3281_p1 }
  0x19   : > { %p3277_p0 = pneg %p3276_p13 }
  0x1b   : > { %p3284_p2 = pnand %p3283_p3, %p3277_p0 }
  0x1d   : > { %3287 = shalt.err (!%p3284_p2)
}
  0x1e   : > { %s3301_s26 = smov 128   ;;  %s3302_s27 = smov 8  }
  0x1f   : > { %3179 = dma.hbm_to_vmem [thread:$0]  (!%p3360_p5), %s3649_s2, 7808, %s131_s15, [#allocation3], %s3301_s26, %s3301_s26, %s3302_s27  }
  0x20   : > { %p3655_p6 = scmp.ne.s32.totalorder %s3653_s16, 0 }
  0x21   : > { %p3656_p8 = scmp.eq.s32.totalorder (!%p3655_p6), %s3347_s13, 0 }
  0x22   : > { %159 = sbr.rel (%p3655_p6) target bundleno = 6148 (0x1804), region = 32 }
  0x29   : > { %3293 = dma.done.wait (%p3656_p8), [#allocation3], 7808   ;;  %p3657_p7 = pmov %p3656_p8 }
  0x2a   : > { %p183_p2 = scmp.lt.s32.totalorder %s3347_s13, 1  ;;  %v3303_v0 = vmov 0   ;;  %v3304_v1 = vmov 0.0|0.0   ;;  %v202_v3 = vld [vmem:[#allocation2] sm:$0xff]  ;;  %v203_v4 = vld [vmem:[#allocation2 + $0x8] sm:$0xff]  ;;  %v204_v6 = vld [vmem:[#allocation2 + $0x10] sm:$0xff]  ;;  %v194_v16 = vlaneseq }
  0x2b   : > { %3295 = vsyncadd (%p3657_p7), [#allocation3], 4294959488  ;;  %3211 = vset.pattern.permute.xlu0 %v3303_v0  ;;  %3088 = vmatprep.subr.bf16.mxu0 %v3304_v1  ;;  %v3089_v5 = vpack.c.bf16 %v203_v4, %v202_v3  ;;  %v205_v7 = vld [vmem:[#allocation2 + $0x18] sm:$0xff]  ;;  %vm3305_vm0 = vmmov 0   ;;  %v3306_v8 = vmov 0.0   ;;  %v206_v10 = vld [vmem:[#allocation2 + $0x20] sm:$0xff] }
  0x2c   : > { %s3659_s13 = smov (!%p183_p2, %s3347_s13), 1  ;;  %3100 = vmatprep.subr.bf16.mxu1 %v3304_v1  ;;  %2879 = vmatprep.mubr.msk.f32.mxu0 %vm3305_vm0, %v3306_v8  ;;  %v3092_v9 = vpack.c.bf16 %v205_v7, %v204_v6  ;;  %v207_v11 = vld [vmem:[#allocation2 + $0x28] sm:$0xff]  ;;  %v208_v13 = vld [vmem:[#allocation2 + $0x30] sm:$0xff]  ;;  %v209_v14 = vld [vmem:[#allocation2 + $0x38] sm:$0xff]  ;;  %v195_v17 = vand.u32 127, %v194_v16  ;;  %vm211_vm1 = vcmask 523264  }
  0x2d   : > { %s2707_s30 = sshll.u32 %s3659_s13, 3  ;;  %2890 = vmatprep.mubr.msk.f32.mxu1 %vm3305_vm0, %v3306_v8  ;;  %3090 = vmatpush3.bf16.msra.mxu0 %v3089_v5  ;;  %v3095_v12 = vpack.c.bf16 %v207_v11, %v206_v10  ;;  %v3098_v15 = vpack.c.bf16 %v209_v14, %v208_v13  ;;  %v210_v20 = vld [vmem:[#allocation2 + $0x40] sm:$0xff]  ;;  %vm287_vm3 = vcmask 261120   ;;  %v315_v30 = vld [vmem:[#allocation2 + $0x98] sm:$0xff]  ;;  %v317_v32 = vld [vmem:[#allocation2 + $0xa8] sm:$0xff]  ;;  %s3307_s7 = smov 72  }
  0x2e   : > { %s186_s6 = scalar_lea.vmem %s3647_s0, %s2707_s30  ;;  %3091 = vmatprep.subr.bf16.mxu0 %v3304_v1  ;;  %v316_v31 = vld [vmem:[#allocation2 + $0xa0] sm:$0xff]  ;;  %v318_v34 = vld [vmem:[#allocation2 + $0xb0] sm:$0xff]  ;;  %v2712_v45 = vld [vmem:[#allocation2 + $0x138] ss:$0 sm:$0xff]  ;;  %s3308_s8 = smov 96   ;;  %vm400_vm4 = vcmask 64512  }
  0x2f   : > { %v193_v2 = vld [vmem:[%s186_s6] sm:$0xff]  ;;  %v3101_v33 = vpack.c.bf16 %v316_v31, %v315_v30  ;;  %v3104_v35 = vpack.c.bf16 %v318_v34, %v317_v32  ;;  %v2710_v40 = vld [vmem:[#allocation2 + $0x90] ss:$0 sm:$0xff]  ;;  %v2711_v42 = vld [vmem:[#allocation2 + $0x91] ss:$0 sm:$0xff]  ;;  %s3309_s9 = smov 88   ;;  %s189_s18 = scalar_lea.vmem %s3648_s1, %s3659_s13 }
  0x30   : > { %197 = vperm.xlu0 %3211, %v193_v2   ;;  %s3310_s10 = smov 120   ;;  %s3311_s11 = smov 80   ;;  %v312_v56 = vld [vmem:[%s189_s18] sm:$0x1]  ;;  %v478_v58 = vshrl.u32 %v194_v16, 7  ;;  %vm1084_vm5 = vcmask 130048  }
  0x31   : > { %3093 = vmatpush3.bf16.msra.mxu0 %v3092_v9  ;;  %3102 = vmatpush3.bf16.msra.mxu1 %v3101_v33  ;;  %s3312_s14 = smov 112   ;;  %s3313_s15 = smov 104   ;;  %v313_v57 = vsub.f32 1.0, %v312_v56  ;;  %vm1086_vm6 = vcmask 195584  }
  0x32   : > { %3094 = vmatprep.subr.bf16.mxu0 %v3304_v1  ;;  %3103 = vmatprep.subr.bf16.mxu1 %v3304_v1  ;;  %v479_v60 = vsub.s32 0, %v478_v58  ;;  %s3314_s19 = smov 64   ;;  %s3315_s20 = smov 48   ;;  %v1089_v58 = vld [vmem:[#allocation2 + $0xc0] sm:$0xff] }
  0x33   : > { %v314_v59 = vmul.f32 -1e+09, %v313_v57  ;;  %s3316_s21 = smov 40   ;;  %s3317_s22 = smov 56   ;;  %v1088_v57 = vld [vmem:[#allocation2 + $0xb8] sm:$0xff] }
  0x34   : > { %s3318_s23 = smov 8   ;;  %s3319_s24 = smov 16  }
  0x35   : > { %3096 = vmatpush3.bf16.msra.mxu0 %v3095_v12  ;;  %3105 = vmatpush3.bf16.msra.mxu1 %v3104_v35  ;;  %v3461_v61 = vrot.slane %v314_v59, %v479_v60  ;;  %v3107_v59 = vpack.c.bf16 %v1089_v58, %v1088_v57  ;;  %s3320_s25 = smov 24   ;;  %s192_s28 = scalar_lea.vmem %s3650_s3, %s3659_s13 }
  0x36   : > { %3097 = vmatprep.subr.bf16.mxu0 %v3304_v1  ;;  %2893 = vmatprep.subr.mxu1 %v3306_v8 }
  0x39   : > { %3099 = vmatpush3.bf16.msra.mxu0 %v3098_v15 }
  0x3a   : > { %2903 = vmatprep.subr.mxu0 %v3306_v8 }
  0xaf   : > { %v198_v18 = vpop.permute.xlu0 %197 }
  0xb0   : > { %vm199_vm2 = vcmp.eq.s32.totalorder %v195_v17, %v198_v18 }
  0xb1   : > { %v2708_v19 = vsel %vm199_vm2, 1.0, %v3306_v8 }
  0xb2   : > { %2880 = vmatmul.mubr.msk.f32.vlgmr.msra.gmra.mrb[0].mxu0 %vm211_vm1, %v2708_v19 }
  0xb3   : > { %2905 = vmatprep.mubr.msk.f32.mxu0 %vm3305_vm0, %v3306_v8 }
 0x185   : > { %v281_v21 = vpop.f32.mrb[0].mxu0 }
 0x186   : > { %v282_v22 = vadd.f32 %v281_v21, %v210_v20  ;;  %v2881_v23 = vpop.f32.mrb[1].mxu0 }
 0x188   : > { %v288_v24 = vsel %vm287_vm3, %v282_v22, 0.0 }
 0x189   : > { %289 = vadd.xlane.f32.xlu0 %v288_v24 }
 0x216   : > { %v290_v25 = vpop.xlane.xlu0 %289 }
 0x217   : > { %v292_v26 = vmul.f32 0.03125, %v290_v25 }
 0x219   : > { %v293_v27 = vsub.f32 %v282_v22, %v292_v26 }
 0x21b   : > { %v294_v28 = vmul.f32 %v293_v27, %v293_v27 }
 0x21d   : > { %v295_v29 = vsel %vm287_vm3, %v294_v28, 0.0 }
 0x21e   : > { %296 = vadd.xlane.f32.xlu1 %v295_v29 }
 0x2ab   : > { %v297_v36 = vpop.xlane.xlu1 %296 }
 0x2ac   : > { %v298_v37 = vmul.f32 0.03125, %v297_v36 }
 0x2ae   : > { %v299_v38 = vadd.f32 1e-12, %v298_v37 }
 0x2b0   : > { %3212 = vrsqrt.f32 %v299_v38 }
 0x2ba   : > { %v3213_v39 = vpop.eup %3212 }
 0x2bb   : > { %v301_v41 = vmul.f32 %v3213_v39, %v293_v27 }
 0x2bd   : > { %v306_v43 = vmul.f32 %v2710_v40, %v301_v41 }
 0x2bf   : > { %v3413_v44 = vadd.f32 %v2711_v42, %v306_v43 }
 0x2c1   : > { %2891 = vmatmul.mubr.msk.f32.vlgmr.msra.gmra.mrb[0].mxu1 %vm287_vm3, %v3413_v44 }
 0x2c2   : > { %2895 = vmatprep.mubr.msk.f32.mxu1 %vm3305_vm0, %v3306_v8 }
 0x394   : > { %v393_v46 = vpop.f32.mrb[0].mxu1 }
 0x395   : > { %v3419_v47 = vadd.f32 %v2712_v45, %v393_v46  ;;  %v2892_v48 = vpop.f32.mrb[1].mxu1 }
 0x397   : > { %906 = vrot.lane.b32.xlu0 %v3419_v47, %s3307_s7  ;;  %398 = vrot.lane.b32.xlu1 %v3419_v47, %s3308_s8 }
 0x39b   : > { %572 = vrot.lane.b32.xlu1 %v3419_v47, %s3309_s9 }
 0x39f   : > { %570 = vrot.lane.b32.xlu1 %v3419_v47, %s3310_s10 }
 0x3a3   : > { %739 = vrot.lane.b32.xlu1 %v3419_v47, %s3311_s11 }
 0x3a7   : > { %737 = vrot.lane.b32.xlu1 %v3419_v47, %s3312_s14 }
 0x3ab   : > { %904 = vrot.lane.b32.xlu1 %v3419_v47, %s3313_s15 }
 0x409   : > { %v399_v49 = vpop.permute.xlu1 %398  ;;  %v907_v54 = vpop.permute.xlu0 %906 }
 0x40a   : > { %2894 = vmatpush3.xpose.msk.msra.mxu1 %vm400_vm4, %v399_v49 }
 0x40b   : > { %2898 = vmatprep.subr.mxu1 %v3306_v8 }
 0x40d   : > { %2896 = vmatmul.mubr.msk.f32.vlgmr.msra.gmra.mrb[2].mxu1 %vm400_vm4, %v3419_v47  ;;  %v573_v50 = vpop.permute.xlu1 %572 }
 0x40e   : > { %2904 = vmatpush3.xpose.msk.msra.mxu0 %vm400_vm4, %v573_v50  ;;  %2900 = vmatprep.mubr.msk.f32.mxu1 %vm3305_vm0, %v3306_v8 }
 0x40f   : > { %2913 = vmatprep.subr.mxu0 %v3306_v8 }
 0x411   : > { %v571_v51 = vpop.permute.xlu1 %570 }
 0x412   : > { %2906 = vmatmul.mubr.msk.f32.vlgmr.msra.gmra.mrb[2].mxu0 %vm400_vm4, %v571_v51 }
 0x413   : > { %2915 = vmatprep.mubr.msk.f32.mxu0 %vm3305_vm0, %v3306_v8 }
 0x415   : > { %v740_v52 = vpop.permute.xlu1 %739 }
 0x416   : > { %2914 = vmatpush3.xpose.msk.msra.mxu0 %vm400_vm4, %v740_v52 }
 0x417   : > { %2923 = vmatprep.subr.mxu0 %v3306_v8 }
 0x419   : > { %v738_v53 = vpop.permute.xlu1 %737 }
 0x41a   : > { %2916 = vmatmul.mubr.msk.f32.vlgmr.msra.gmra.mrb[4].mxu0 %vm400_vm4, %v738_v53 }
 0x41b   : > { %2924 = vmatpush3.xpose.msk.msra.mxu0 %vm400_vm4, %v907_v54  ;;  %2925 = vmatprep.mubr.msk.f32.mxu0 %vm3305_vm0, %v3306_v8 }
 0x41c   : > { %3106 = vmatprep.subr.bf16.mxu0 %v3304_v1 }
 0x41d   : > { %v905_v55 = vpop.permute.xlu1 %904 }
 0x41e   : > { %2926 = vmatmul.mubr.msk.f32.vlgmr.msra.gmra.mrb[6].mxu0 %vm400_vm4, %v905_v55 }
 0x41f   : > { %2941 = vmatprep.mubr.msk.f32.mxu0 %vm3305_vm0, %v3306_v8  ;;  %3108 = vmatpush3.bf16.msra.mxu0 %v3107_v59 }
 0x420   : > { %3109 = vmatprep.subr.bf16.mxu0 %v3304_v1 }
 0x4e0   : > { %v471_v62 = vpop.f32.mrb[2].mxu1 }
 0x4e1   : > { %v475_v63 = vmul.f32 0.35355338, %v471_v62  ;;  %v2897_v0 = vpop.f32.mrb[3].mxu1 }
 0x4e2   : > { %v1091_v0 = vld [vmem:[#allocation2 + $0xd0] sm:$0xff] }
 0x4e3   : > { %v482_v2 = vadd.f32 %v3461_v61, %v475_v63  ;;  %v1090_v63 = vld [vmem:[#allocation2 + $0xc8] sm:$0xff] }
 0x4e5   : > { %v644_v3 = vpop.f32.mrb[2].mxu0  ;;  %v483_v4 = vsel %vm400_vm4, %v482_v2, -inf }
 0x4e6   : > { %v648_v5 = vmul.f32 0.35355338, %v644_v3  ;;  %484 = vmax.xlane.f32.xlu1 %v483_v4  ;;  %v2907_v6 = vpop.f32.mrb[3].mxu0 }
 0x4e8   : > { %v649_v7 = vadd.f32 %v648_v5, %v3461_v61 }
 0x4ea   : > { %v650_v9 = vsel %vm400_vm4, %v649_v7, -inf }
 0x4eb   : > { %651 = vmax.xlane.f32.xlu0 %v650_v9 }
 0x4ed   : > { %v811_v10 = vpop.f32.mrb[4].mxu0 }
 0x4ee   : > { %v815_v11 = vmul.f32 0.35355338, %v811_v10  ;;  %v2917_v12 = vpop.f32.mrb[5].mxu0 }
 0x4f0   : > { %v816_v13 = vadd.f32 %v815_v11, %v3461_v61 }
 0x4f1   : > { %v978_v14 = vpop.f32.mrb[6].mxu0 }
 0x4f2   : > { %v982_v15 = vmul.f32 0.35355338, %v978_v14  ;;  %v2927_v16 = vpop.f32.mrb[7].mxu0  ;;  %v817_v17 = vsel %vm400_vm4, %v816_v13, -inf }
 0x4f3   : > { %818 = vmax.xlane.f32.xlu1 %v817_v17  ;;  %v2726_v16 = vld [vmem:[#allocation2 + $0x139] ss:$0 sm:$0xff] }
 0x4f4   : > { %v983_v18 = vadd.f32 %v982_v15, %v3461_v61 }
 0x4f6   : > { %v984_v19 = vsel %vm400_vm4, %v983_v18, -inf }
 0x4f7   : > { %985 = vmax.xlane.f32.xlu1 %v984_v19 }
 0x508   : > { %494 = vrot.lane.b32.xlu1 %v3419_v47, %s3314_s19 }
 0x573   : > { %v485_v20 = vpop.xlane.xlu1 %484 }
 0x574   : > { %v486_v21 = vsub.f32 %v482_v2, %v485_v20  ;;  %v3110_v2 = vpack.c.bf16 %v1091_v0, %v1090_v63 }
 0x576   : > { %v487_v22 = vmul.f32 1.442695, %v486_v21  ;;  %3111 = vmatpush3.bf16.msra.mxu0 %v3110_v2 }
 0x577   : > { %3118 = vmatprep.subr.bf16.mxu0 %v3304_v1 }
 0x578   : > { %3214 = vpow2.f32 %v487_v22  ;;  %v652_v23 = vpop.xlane.xlu0 %651 }
 0x579   : > { %v653_v24 = vsub.f32 %v649_v7, %v652_v23 }
 0x57b   : > { %v654_v25 = vmul.f32 1.442695, %v653_v24 }
 0x57d   : > { %3216 = vpow2.f32 %v654_v25 }
 0x580   : > { %v819_v26 = vpop.xlane.xlu1 %818 }
 0x581   : > { %v820_v27 = vsub.f32 %v816_v13, %v819_v26 }
 0x582   : > { %v3215_v28 = vpop.eup %3214 }
 0x583   : > { %v821_v29 = vmul.f32 1.442695, %v820_v27  ;;  %v489_v30 = vsel %vm400_vm4, %v3215_v28, 0.0  ;;  %v1196_v27 = vld [vmem:[#allocation2 + $0xd8] sm:$0xff] }
 0x584   : > { %490 = vadd.xlane.f32.xlu1 %v489_v30  ;;  %v986_v31 = vpop.xlane.xlu1 %985  ;;  %v1198_v30 = vld [vmem:[#allocation2 + $0xe8] sm:$0xff] }
 0x585   : > { %3218 = vpow2.f32 %v821_v29  ;;  %v987_v32 = vsub.f32 %v983_v18, %v986_v31  ;;  %v1199_v31 = vld [vmem:[#allocation2 + $0xf0] sm:$0xff] }
 0x587   : > { %v3217_v33 = vpop.eup %3216  ;;  %v988_v34 = vmul.f32 1.442695, %v987_v32  ;;  %v3116_v32 = vpack.c.bf16 %v1199_v31, %v1198_v30 }
 0x588   : > { %v495_v35 = vpop.permute.xlu1 %494  ;;  %v656_v36 = vsel %vm400_vm4, %v3217_v33, 0.0 }
 0x589   : > { %3220 = vpow2.f32 %v988_v34  ;;  %657 = vadd.xlane.f32.xlu0 %v656_v36  ;;  %2899 = vmatpush3.msra.mxu1 %v495_v35  ;;  %v2728_v36 = vld [vmem:[#allocation2 + $0x13a] ss:$0 sm:$0xff] }
 0x58a   : > { %2908 = vmatprep.subr.mxu1 %v3306_v8 }
 0x58f   : > { %v3219_v37 = vpop.eup %3218 }
 0x590   : > { %v823_v38 = vsel %vm400_vm4, %v3219_v37, 0.0 }
 0x591   : > { %824 = vadd.xlane.f32.xlu1 %v823_v38  ;;  %v2729_v38 = vld [vmem:[#allocation2 + $0x13b] ss:$0 sm:$0xff] }
 0x593   : > { %v3221_v39 = vpop.eup %3220 }
 0x594   : > { %v990_v40 = vsel %vm400_vm4, %v3221_v39, 0.0 }
 0x595   : > { %991 = vadd.xlane.f32.xlu0 %v990_v40 }
 0x5a2   : > { %828 = vrot.lane.b32.xlu1 %v3419_v47, %s3315_s20 }
 0x5a6   : > { %995 = vrot.lane.b32.xlu1 %v3419_v47, %s3316_s21 }
 0x5ab   : > { %661 = vrot.lane.b32.xlu0 %v3419_v47, %s3317_s22 }
 0x611   : > { %v491_v41 = vpop.xlane.xlu1 %490 }
 0x612   : > { %3222 = vrcp.f32 %v491_v41  ;;  %v1287_v41 = vld [vmem:[#allocation2 + $0xf8] sm:$0xff] }
 0x616   : > { %v658_v42 = vpop.xlane.xlu0 %657 }
 0x617   : > { %3224 = vrcp.f32 %v658_v42  ;;  %v1288_v42 = vld [vmem:[#allocation2 + $0x100] sm:$0xff] }
 0x61c   : > { %v3223_v43 = vpop.eup %3222 }
 0x61d   : > { %v493_v45 = vmul.f32 %v3223_v43, %v3215_v28  ;;  %v1197_v28 = vld [vmem:[#allocation2 + $0xe0] sm:$0xff]  ;;  %v3119_v43 = vpack.c.bf16 %v1288_v42, %v1287_v41 }
 0x61e   : > { %v825_v46 = vpop.xlane.xlu1 %824  ;;  %v3113_v29 = vpack.c.bf16 %v1197_v28, %v1196_v27  ;;  %v2734_v27 = vld [vmem:[#allocation2 + $0x13e] ss:$0 sm:$0xff] }
 0x61f   : > { %3226 = vrcp.f32 %v825_v46  ;;  %2901 = vmatmul.mubr.msk.f32.vlgmr.msra.gmra.mrb[4].mxu1 %vm400_vm4, %v493_v45  ;;  %v1289_v45 = vld [vmem:[#allocation2 + $0x108] sm:$0xff]  ;;  %v1290_v46 = vld [vmem:[#allocation2 + $0x110] sm:$0xff] }
 0x620   : > { %2910 = vmatprep.mubr.msk.f32.mxu1 %vm3305_vm0, %v3306_v8 }
 0x621   : > { %v3225_v49 = vpop.eup %3224 }
 0x622   : > { %v992_v48 = vpop.xlane.xlu0 %991  ;;  %v660_v50 = vmul.f32 %v3225_v49, %v3217_v33  ;;  %v829_v51 = vpop.permute.xlu1 %828  ;;  %v1291_v49 = vld [vmem:[#allocation2 + $0x118] sm:$0xff] }
 0x623   : > { %3228 = vrcp.f32 %v992_v48  ;;  %v3122_v48 = vpack.c.bf16 %v1290_v46, %v1289_v45 }
 0x626   : > { %v662_v52 = vpop.permute.xlu0 %661  ;;  %v996_v54 = vpop.permute.xlu1 %995 }
 0x627   : > { %2909 = vmatpush3.msra.mxu1 %v662_v52  ;;  %v1293_v52 = vld [vmem:[#allocation2 + $0x128] sm:$0xff] }
 0x628   : > { %2911 = vmatmul.mubr.msk.f32.vlgmr.msra.gmra.mrb[6].mxu1 %vm400_vm4, %v660_v50  ;;  %2918 = vmatprep.subr.mxu1 %v3306_v8  ;;  %v1292_v50 = vld [vmem:[#allocation2 + $0x120] sm:$0xff] }
 0x629   : > { %v3227_v47 = vpop.eup %3226  ;;  %2919 = vmatpush3.msra.mxu1 %v829_v51  ;;  %2920 = vmatprep.mubr.msk.f32.mxu1 %vm3305_vm0, %v3306_v8  ;;  %v3125_v51 = vpack.c.bf16 %v1292_v50, %v1291_v49 }
 0x62a   : > { %v827_v53 = vmul.f32 %v3227_v47, %v3219_v37  ;;  %2928 = vmatprep.subr.mxu1 %v3306_v8  ;;  %v1294_v47 = vld [vmem:[#allocation2 + $0x130] sm:$0xff] }
 0x62c   : > { %2921 = vmatmul.mubr.msk.f32.vlgmr.msra.gmra.mrb[8].mxu1 %vm400_vm4, %v827_v53  ;;  %v3128_v53 = vpack.c.bf16 %v1294_v47, %v1293_v52 }
 0x62d   : > { %v3229_v55 = vpop.eup %3228  ;;  %2929 = vmatpush3.msra.mxu1 %v996_v54  ;;  %2930 = vmatprep.mubr.msk.f32.mxu1 %vm3305_vm0, %v3306_v8  ;;  %v2730_v54 = vld [vmem:[#allocation2 + $0x13c] ss:$0 sm:$0xff] }
 0x62e   : > { %v994_v56 = vmul.f32 %v3229_v55, %v3221_v39  ;;  %3112 = vmatprep.subr.bf16.mxu1 %v3304_v1 }
 0x630   : > { %2931 = vmatmul.mubr.msk.f32.vlgmr.msra.gmra.mrb[10].mxu1 %vm400_vm4, %v994_v56 }
 0x631   : > { %2952 = vmatprep.mubr.msk.f32.mxu1 %vm3305_vm0, %v3306_v8  ;;  %3114 = vmatpush3.bf16.msra.mxu1 %v3113_v29  ;;  %v2735_v29 = vld [vmem:[#allocation2 + $0x13f] ss:$0 sm:$0xff] }
 0x632   : > { %3115 = vmatprep.subr.bf16.mxu1 %v3304_v1 }
 0x635   : > { %3117 = vmatpush3.bf16.msra.mxu1 %v3116_v32  ;;  %v2736_v32 = vld [vmem:[#allocation2 + $0x1e0] ss:$0 sm:$0xff] }
 0x636   : > { %3130 = vmatprep.subr.bf16.mxu1 %v3304_v1 }
 0x6f2   : > { %v566_v60 = vpop.f32.mrb[4].mxu1 }
 0x6f3   : > { %v2902_v62 = vpop.f32.mrb[5].mxu1 }
 0x6fb   : > { %v733_v3 = vpop.f32.mrb[6].mxu1 }
 0x6fc   : > { %1072 = vrot.lane.b32.xlu0 %v733_v3, %s3318_s23  ;;  %v2912_v4 = vpop.f32.mrb[7].mxu1 }
 0x6ff   : > { %v900_v5 = vpop.f32.mrb[8].mxu1 }
 0x700   : > { %1076 = vrot.lane.b32.xlu1 %v900_v5, %s3319_s24  ;;  %v2922_v6 = vpop.f32.mrb[9].mxu1  ;;  %v2732_v5 = vld [vmem:[#allocation2 + $0x13d] ss:$0 sm:$0xff] }
 0x703   : > { %v1067_v7 = vpop.f32.mrb[10].mxu1 }
 0x704   : > { %1080 = vrot.lane.b32.xlu0 %v1067_v7, %s3320_s25  ;;  %v2932_v9 = vpop.f32.mrb[11].mxu1 }
 0x76e   : > { %v1073_v10 = vpop.permute.xlu0 %1072 }
 0x76f   : > { %v1083_v12 = vsel %vm400_vm4, %v566_v60, %v1073_v10 }
 0x772   : > { %v1077_v11 = vpop.permute.xlu1 %1076 }
 0x773   : > { %v1085_v13 = vsel %vm1084_vm5, %v1083_v12, %v1077_v11 }
 0x776   : > { %v1081_v14 = vpop.permute.xlu0 %1080 }
 0x777   : > { %v1087_v15 = vsel %vm1086_vm6, %v1085_v13, %v1081_v14 }
 0x778   : > { %2942 = vmatmul.mubr.msk.f32.vlgmr.msra.gmra.mrb[8].mxu0 %vm287_vm3, %v1087_v15 }
 0x779   : > { %2971 = vmatprep.mubr.msk.f32.mxu0 %vm3305_vm0, %v3306_v8  ;;  %3120 = vmatpush3.bf16.msra.mxu0 %v3119_v43 }
 0x77a   : > { %3121 = vmatprep.subr.bf16.mxu0 %v3304_v1 }
 0x77d   : > { %3123 = vmatpush3.bf16.msra.mxu0 %v3122_v48 }
 0x77e   : > { %3124 = vmatprep.subr.bf16.mxu0 %v3304_v1 }
 0x781   : > { %3126 = vmatpush3.bf16.msra.mxu0 %v3125_v51 }
 0x782   : > { %3127 = vmatprep.subr.bf16.mxu0 %v3304_v1 }
 0x785   : > { %3129 = vmatpush3.bf16.msra.mxu0 %v3128_v53 }
 0x786   : > { %2995 = vmatprep.subr.mxu0 %v3306_v8 }
 0x84b   : > { %v1166_v17 = vpop.f32.mrb[8].mxu0 }
 0x84c   : > { %v1167_v18 = vadd.f32 %v2726_v16, %v1166_v17  ;;  %v2943_v19 = vpop.f32.mrb[9].mxu0  ;;  %v1399_v17 = vld [vmem:[#allocation2 + $0x140] sm:$0xff] }
 0x84e   : > { %v1170_v20 = vadd.f32 %v1167_v18, %v3413_v44  ;;  %v1400_v18 = vld [vmem:[#allocation2 + $0x148] sm:$0xff] }
 0x84f   : > { %v3131_v19 = vpack.c.bf16 %v1400_v18, %v1399_v17 }
 0x850   : > { %v1173_v21 = vsel %vm287_vm3, %v1170_v20, 0.0 }
 0x851   : > { %1174 = vadd.xlane.f32.xlu1 %v1173_v21  ;;  %v1402_v21 = vld [vmem:[#allocation2 + $0x158] sm:$0xff] }
 0x8de   : > { %v1175_v22 = vpop.xlane.xlu1 %1174 }
 0x8df   : > { %v1176_v23 = vmul.f32 0.03125, %v1175_v22 }
 0x8e1   : > { %v1177_v24 = vsub.f32 %v1170_v20, %v1176_v23  ;;  %v1401_v20 = vld [vmem:[#allocation2 + $0x150] sm:$0xff] }
 0x8e2   : > { %v3134_v22 = vpack.c.bf16 %v1402_v21, %v1401_v20 }
 0x8e3   : > { %v1178_v25 = vmul.f32 %v1177_v24, %v1177_v24 }
 0x8e5   : > { %v1179_v26 = vsel %vm287_vm3, %v1178_v25, 0.0 }
 0x8e6   : > { %1180 = vadd.xlane.f32.xlu0 %v1179_v26 }
 0x973   : > { %v1181_v44 = vpop.xlane.xlu0 %1180 }
 0x974   : > { %v1182_v33 = vmul.f32 0.03125, %v1181_v44 }
 0x976   : > { %v1183_v34 = vadd.f32 1e-12, %v1182_v33 }
 0x978   : > { %3230 = vrsqrt.f32 %v1183_v34 }
 0x982   : > { %v3231_v35 = vpop.eup %3230 }
 0x983   : > { %v1185_v37 = vmul.f32 %v3231_v35, %v1177_v24 }
 0x985   : > { %v1190_v39 = vmul.f32 %v2728_v36, %v1185_v37 }
 0x987   : > { %v1195_v40 = vadd.f32 %v2729_v38, %v1190_v39 }
 0x989   : > { %2953 = vmatmul.mubr.msk.f32.vlgmr.msra.gmra.mrb[12].mxu1 %vm287_vm3, %v1195_v40 }
 0x98a   : > { %2982 = vmatprep.mubr.msk.f32.mxu1 %vm3305_vm0, %v3306_v8  ;;  %3132 = vmatpush3.bf16.msra.mxu1 %v3131_v19 }
 0x98b   : > { %3133 = vmatprep.subr.bf16.mxu1 %v3304_v1 }
 0x98e   : > { %3135 = vmatpush3.bf16.msra.mxu1 %v3134_v22 }
 0x98f   : > { %2985 = vmatprep.subr.mxu1 %v3306_v8 }
 0xa5c   : > { %v1274_v55 = vpop.f32.mrb[12].mxu1 }
 0xa5d   : > { %v1275_v56 = vadd.f32 %v2730_v54, %v1274_v55  ;;  %v2954_v57 = vpop.f32.mrb[13].mxu1 }
 0xa5f   : > { %v1279_v58 = vmul.f32 0.044715, %v1275_v56  ;;  %v1278_v2 = vmul.f32 0.5, %v1275_v56 }
 0xa61   : > { %v1280_v59 = vmul.f32 %v1279_v58, %v1275_v56 }
 0xa63   : > { %v1281_v60 = vmul.f32 %v1280_v59, %v1275_v56 }
 0xa65   : > { %v1282_v62 = vadd.f32 %v1281_v60, %v1275_v56 }
 0xa67   : > { %v1283_v63 = vmul.f32 0.7978846, %v1282_v62 }
 0xa69   : > { %3232 = vtanh.f32 %v1283_v63 }
 0xa73   : > { %v3233_v0 = vpop.eup %3232 }
 0xa74   : > { %v1285_v3 = vadd.f32 1.0, %v3233_v0 }
 0xa76   : > { %v1286_v4 = vmul.f32 %v1285_v3, %v1278_v2 }
 0xa78   : > { %2972 = vmatmul.mubr.msk.f32.vlgmr.msra.gmra.mrb[10].mxu0 %vm211_vm1, %v1286_v4 }
 0xa79   : > { %2997 = vmatprep.mubr.msk.f32.mxu0 %vm3305_vm0, %v3306_v8 }
 0xb4b   : > { %v1369_v6 = vpop.f32.mrb[10].mxu0 }
 0xb4c   : > { %v1370_v7 = vadd.f32 %v2732_v5, %v1369_v6  ;;  %v2973_v9 = vpop.f32.mrb[11].mxu0 }
 0xb4e   : > { %v1373_v10 = vadd.f32 %v1370_v7, %v1195_v40 }
 0xb50   : > { %v1376_v11 = vsel %vm287_vm3, %v1373_v10, 0.0 }
 0xb51   : > { %1377 = vadd.xlane.f32.xlu0 %v1376_v11 }
 0xbde   : > { %v1378_v12 = vpop.xlane.xlu0 %1377 }
 0xbdf   : > { %v1379_v13 = vmul.f32 0.03125, %v1378_v12 }
 0xbe1   : > { %v1380_v14 = vsub.f32 %v1373_v10, %v1379_v13 }
 0xbe3   : > { %v1381_v15 = vmul.f32 %v1380_v14, %v1380_v14 }
 0xbe5   : > { %v1382_v16 = vsel %vm287_vm3, %v1381_v15, 0.0 }
 0xbe6   : > { %1383 = vadd.xlane.f32.xlu1 %v1382_v16 }
 0xc73   : > { %v1384_v23 = vpop.xlane.xlu1 %1383 }
 0xc74   : > { %v1385_v24 = vmul.f32 0.03125, %v1384_v23 }
 0xc76   : > { %v1386_v25 = vadd.f32 1e-12, %v1385_v24 }
 0xc78   : > { %3234 = vrsqrt.f32 %v1386_v25 }
 0xc82   : > { %v3235_v26 = vpop.eup %3234 }
 0xc83   : > { %v1388_v28 = vmul.f32 %v3235_v26, %v1380_v14 }
 0xc85   : > { %v1393_v30 = vmul.f32 %v2734_v27, %v1388_v28 }
 0xc87   : > { %v3529_v31 = vadd.f32 %v2735_v29, %v1393_v30 }
 0xc89   : > { %2983 = vmatmul.mubr.msk.f32.vlgmr.msra.gmra.mrb[14].mxu1 %vm287_vm3, %v3529_v31 }
 0xc8a   : > { %2987 = vmatprep.mubr.msk.f32.mxu1 %vm3305_vm0, %v3306_v8 }
 0xd5c   : > { %v1477_v44 = vpop.f32.mrb[14].mxu1 }
 0xd5d   : > { %v3535_v33 = vadd.f32 %v2736_v32, %v1477_v44  ;;  %v2984_v34 = vpop.f32.mrb[15].mxu1 }
 0xd5f   : > { %1649 = vrot.lane.b32.xlu1 %v3535_v33, %s3309_s9  ;;  %1482 = vrot.lane.b32.xlu0 %v3535_v33, %s3308_s8 }
 0xd63   : > { %1647 = vrot.lane.b32.xlu1 %v3535_v33, %s3310_s10  ;;  %1816 = vrot.lane.b32.xlu0 %v3535_v33, %s3311_s11 }
 0xd67   : > { %1814 = vrot.lane.b32.xlu1 %v3535_v33, %s3312_s14  ;;  %1983 = vrot.lane.b32.xlu0 %v3535_v33, %s3307_s7 }
 0xd6b   : > { %1981 = vrot.lane.b32.xlu1 %v3535_v33, %s3313_s15 }
 0xdd1   : > { %v1650_v35 = vpop.permute.xlu1 %1649  ;;  %v1483_v36 = vpop.permute.xlu0 %1482 }
 0xdd2   : > { %2986 = vmatpush3.xpose.msk.msra.mxu1 %vm400_vm4, %v1483_v36  ;;  %2996 = vmatpush3.xpose.msk.msra.mxu0 %vm400_vm4, %v1650_v35 }
 0xdd3   : > { %3005 = vmatprep.subr.mxu0 %v3306_v8  ;;  %2990 = vmatprep.subr.mxu1 %v3306_v8 }
 0xdd5   : > { %v1648_v37 = vpop.permute.xlu1 %1647  ;;  %2988 = vmatmul.mubr.msk.f32.vlgmr.msra.gmra.mrb[16].mxu1 %vm400_vm4, %v3535_v33  ;;  %v1817_v38 = vpop.permute.xlu0 %1816 }
 0xdd6   : > { %2998 = vmatmul.mubr.msk.f32.vlgmr.msra.gmra.mrb[12].mxu0 %vm400_vm4, %v1648_v37  ;;  %2992 = vmatprep.mubr.msk.f32.mxu1 %vm3305_vm0, %v3306_v8  ;;  %v2163_v37 = vld [vmem:[#allocation2 + $0x160] sm:$0xff] }
 0xdd7   : > { %3006 = vmatpush3.xpose.msk.msra.mxu0 %vm400_vm4, %v1817_v38  ;;  %3007 = vmatprep.mubr.msk.f32.mxu0 %vm3305_vm0, %v3306_v8  ;;  %v2164_v38 = vld [vmem:[#allocation2 + $0x168] sm:$0xff] }
 0xdd8   : > { %3015 = vmatprep.subr.mxu0 %v3306_v8 }
 0xdd9   : > { %v1815_v39 = vpop.permute.xlu1 %1814  ;;  %v1984_v40 = vpop.permute.xlu0 %1983 }
 0xdda   : > { %3008 = vmatmul.mubr.msk.f32.vlgmr.msra.gmra.mrb[14].mxu0 %vm400_vm4, %v1815_v39  ;;  %v3137_v39 = vpack.c.bf16 %v2164_v38, %v2163_v37 }
 0xddb   : > { %3016 = vmatpush3.xpose.msk.msra.mxu0 %vm400_vm4, %v1984_v40  ;;  %3017 = vmatprep.mubr.msk.f32.mxu0 %vm3305_vm0, %v3306_v8  ;;  %v2165_v40 = vld [vmem:[#allocation2 + $0x170] sm:$0xff] }
 0xddc   : > { %3136 = vmatprep.subr.bf16.mxu0 %v3304_v1 }
 0xddd   : > { %v1982_v41 = vpop.permute.xlu1 %1981 }
 0xdde   : > { %3018 = vmatmul.mubr.msk.f32.vlgmr.msra.gmra.mrb[16].mxu0 %vm400_vm4, %v1982_v41  ;;  %v2166_v41 = vld [vmem:[#allocation2 + $0x178] sm:$0xff] }
 0xddf   : > { %3033 = vmatprep.mubr.msk.f32.mxu0 %vm3305_vm0, %v3306_v8  ;;  %3138 = vmatpush3.bf16.msra.mxu0 %v3137_v39 }
 0xde0   : > { %3139 = vmatprep.subr.bf16.mxu0 %v3304_v1 }
 0xea8   : > { %v1554_v42 = vpop.f32.mrb[16].mxu1 }
 0xea9   : > { %v1558_v43 = vmul.f32 0.35355338, %v1554_v42  ;;  %v2989_v45 = vpop.f32.mrb[17].mxu1  ;;  %v1721_v46 = vpop.f32.mrb[12].mxu0  ;;  %v3140_v42 = vpack.c.bf16 %v2166_v41, %v2165_v40 }
 0xeaa   : > { %v1725_v48 = vmul.f32 0.35355338, %v1721_v46  ;;  %v2999_v49 = vpop.f32.mrb[13].mxu0 }
 0xeab   : > { %v1559_v50 = vadd.f32 %v1558_v43, %v3461_v61  ;;  %3141 = vmatpush3.bf16.msra.mxu0 %v3140_v42 }
 0xeac   : > { %v1726_v51 = vadd.f32 %v1725_v48, %v3461_v61  ;;  %3148 = vmatprep.subr.bf16.mxu0 %v3304_v1 }
 0xead   : > { %v1888_v52 = vpop.f32.mrb[14].mxu0  ;;  %v1560_v47 = vsel %vm400_vm4, %v1559_v50, -inf }
 0xeae   : > { %v1892_v53 = vmul.f32 0.35355338, %v1888_v52  ;;  %1561 = vmax.xlane.f32.xlu0 %v1560_v47  ;;  %v3009_v54 = vpop.f32.mrb[15].mxu0  ;;  %v1727_v55 = vsel %vm400_vm4, %v1726_v51, -inf }
 0xeaf   : > { %1728 = vmax.xlane.f32.xlu1 %v1727_v55 }
 0xeb0   : > { %v1893_v56 = vadd.f32 %v1892_v53, %v3461_v61 }
 0xeb1   : > { %v2055_v57 = vpop.f32.mrb[16].mxu0 }
 0xeb2   : > { %v2059_v58 = vmul.f32 0.35355338, %v2055_v57  ;;  %v3019_v59 = vpop.f32.mrb[17].mxu0  ;;  %v1894_v60 = vsel %vm400_vm4, %v1893_v56, -inf }
 0xeb3   : > { %1895 = vmax.xlane.f32.xlu0 %v1894_v60 }
 0xeb4   : > { %v2060_v62 = vadd.f32 %v2059_v58, %v3461_v61  ;;  %v2750_v58 = vld [vmem:[#allocation2 + $0x1e1] ss:$0 sm:$0xff] }
 0xeb6   : > { %v2061_v63 = vsel %vm400_vm4, %v2060_v62, -inf }
 0xeb7   : > { %2062 = vmax.xlane.f32.xlu0 %v2061_v63 }
 0xec0   : > { %1571 = vrot.lane.b32.xlu1 %v3535_v33, %s3314_s19 }
 0xf3b   : > { %v1562_v0 = vpop.xlane.xlu0 %1561 }
 0xf3c   : > { %v1563_v2 = vsub.f32 %v1559_v50, %v1562_v0  ;;  %v1729_v3 = vpop.xlane.xlu1 %1728 }
 0xf3d   : > { %v1730_v4 = vsub.f32 %v1726_v51, %v1729_v3 }
 0xf3e   : > { %v1564_v5 = vmul.f32 1.442695, %v1563_v2 }
 0xf3f   : > { %v1731_v6 = vmul.f32 1.442695, %v1730_v4 }
 0xf40   : > { %3236 = vpow2.f32 %v1564_v5  ;;  %v1572_v7 = vpop.permute.xlu1 %1571  ;;  %v1896_v9 = vpop.xlane.xlu0 %1895 }
 0xf41   : > { %3238 = vpow2.f32 %v1731_v6  ;;  %v1897_v10 = vsub.f32 %v1893_v56, %v1896_v9  ;;  %2991 = vmatpush3.msra.mxu1 %v1572_v7  ;;  %v2271_v7 = vld [vmem:[#allocation2 + $0x180] sm:$0xff]  ;;  %v2272_v9 = vld [vmem:[#allocation2 + $0x188] sm:$0xff] }
 0xf42   : > { %3000 = vmatprep.subr.mxu1 %v3306_v8 }
 0xf43   : > { %v1898_v61 = vmul.f32 1.442695, %v1897_v10  ;;  %v3143_v10 = vpack.c.bf16 %v2272_v9, %v2271_v7  ;;  %v2759_v9 = vld [vmem:[#allocation2 + $0x1e7] ss:$0 sm:$0xff] }
 0xf44   : > { %v2063_v11 = vpop.xlane.xlu0 %2062 }
 0xf45   : > { %3240 = vpow2.f32 %v1898_v61  ;;  %v2064_v12 = vsub.f32 %v2060_v62, %v2063_v11  ;;  %v2273_v61 = vld [vmem:[#allocation2 + $0x190] sm:$0xff]  ;;  %v2274_v11 = vld [vmem:[#allocation2 + $0x198] sm:$0xff] }
 0xf47   : > { %v2065_v13 = vmul.f32 1.442695, %v2064_v12  ;;  %v3146_v12 = vpack.c.bf16 %v2274_v11, %v2273_v61  ;;  %v2553_v11 = vld [vmem:[#allocation2 + $0x70] sm:$0xff] }
 0xf49   : > { %3242 = vpow2.f32 %v2065_v13 }
 0xf4a   : > { %v3237_v14 = vpop.eup %3236 }
 0xf4b   : > { %v3239_v15 = vpop.eup %3238  ;;  %v1566_v16 = vsel %vm400_vm4, %v3237_v14, 0.0 }
 0xf4c   : > { %1567 = vadd.xlane.f32.xlu1 %v1566_v16  ;;  %v1733_v17 = vsel %vm400_vm4, %v3239_v15, 0.0  ;;  %v2752_v16 = vld [vmem:[#allocation2 + $0x1e2] ss:$0 sm:$0xff] }
 0xf4d   : > { %1734 = vadd.xlane.f32.xlu0 %v1733_v17 }
 0xf4f   : > { %v3241_v18 = vpop.eup %3240 }
 0xf50   : > { %v1900_v19 = vsel %vm400_vm4, %v3241_v18, 0.0 }
 0xf51   : > { %1901 = vadd.xlane.f32.xlu1 %v1900_v19 }
 0xf53   : > { %v3243_v20 = vpop.eup %3242 }
 0xf54   : > { %v2067_v21 = vsel %vm400_vm4, %v3243_v20, 0.0 }
 0xf55   : > { %2068 = vadd.xlane.f32.xlu0 %v2067_v21  ;;  %v2362_v21 = vld [vmem:[#allocation2 + $0x1a0] sm:$0xff] }
 0xf62   : > { %1905 = vrot.lane.b32.xlu1 %v3535_v33, %s3315_s20 }
 0xf66   : > { %2072 = vrot.lane.b32.xlu1 %v3535_v33, %s3316_s21 }
 0xf6b   : > { %1738 = vrot.lane.b32.xlu0 %v3535_v33, %s3317_s22 }
 0xfd9   : > { %v1568_v22 = vpop.xlane.xlu1 %1567 }
 0xfda   : > { %3244 = vrcp.f32 %v1568_v22  ;;  %v1735_v23 = vpop.xlane.xlu0 %1734  ;;  %v2363_v22 = vld [vmem:[#allocation2 + $0x1a8] sm:$0xff] }
 0xfdb   : > { %3246 = vrcp.f32 %v1735_v23  ;;  %v3149_v23 = vpack.c.bf16 %v2363_v22, %v2362_v21 }
 0xfde   : > { %v1902_v24 = vpop.xlane.xlu1 %1901 }
 0xfdf   : > { %3248 = vrcp.f32 %v1902_v24  ;;  %v2364_v24 = vld [vmem:[#allocation2 + $0x1b0] sm:$0xff] }
 0xfe2   : > { %v2069_v25 = vpop.xlane.xlu0 %2068  ;;  %v1906_v32 = vpop.permute.xlu1 %1905 }
 0xfe3   : > { %3250 = vrcp.f32 %v2069_v25  ;;  %v2365_v25 = vld [vmem:[#allocation2 + $0x1b8] sm:$0xff] }
 0xfe4   : > { %v3245_v26 = vpop.eup %3244 }
 0xfe5   : > { %v1570_v27 = vmul.f32 %v3245_v26, %v3237_v14  ;;  %v3247_v28 = vpop.eup %3246  ;;  %v3152_v26 = vpack.c.bf16 %v2365_v25, %v2364_v24 }
 0xfe6   : > { %v1739_v29 = vpop.permute.xlu0 %1738  ;;  %v1737_v30 = vmul.f32 %v3247_v28, %v3239_v15  ;;  %v2073_v35 = vpop.permute.xlu1 %2072  ;;  %v2367_v28 = vld [vmem:[#allocation2 + $0x1c8] sm:$0xff] }
 0xfe7   : > { %2993 = vmatmul.mubr.msk.f32.vlgmr.msra.gmra.mrb[18].mxu1 %vm400_vm4, %v1570_v27  ;;  %v2366_v27 = vld [vmem:[#allocation2 + $0x1c0] sm:$0xff] }
 0xfe8   : > { %3001 = vmatpush3.msra.mxu1 %v1739_v29  ;;  %3002 = vmatprep.mubr.msk.f32.mxu1 %vm3305_vm0, %v3306_v8  ;;  %v3155_v29 = vpack.c.bf16 %v2367_v28, %v2366_v27 }
 0xfe9   : > { %3010 = vmatprep.subr.mxu1 %v3306_v8  ;;  %v3249_v44 = vpop.eup %3248 }
 0xfea   : > { %v1904_v33 = vmul.f32 %v3249_v44, %v3241_v18  ;;  %v2753_v18 = vld [vmem:[#allocation2 + $0x1e3] ss:$0 sm:$0xff] }
 0xfeb   : > { %3003 = vmatmul.mubr.msk.f32.vlgmr.msra.gmra.mrb[20].mxu1 %vm400_vm4, %v1737_v30  ;;  %v2368_v30 = vld [vmem:[#allocation2 + $0x1d0] sm:$0xff] }
 0xfec   : > { %3011 = vmatpush3.msra.mxu1 %v1906_v32  ;;  %3012 = vmatprep.mubr.msk.f32.mxu1 %vm3305_vm0, %v3306_v8  ;;  %v2369_v32 = vld [vmem:[#allocation2 + $0x1d8] sm:$0xff] }
 0xfed   : > { %3020 = vmatprep.subr.mxu1 %v3306_v8  ;;  %v3251_v34 = vpop.eup %3250  ;;  %v3158_v44 = vpack.c.bf16 %v2369_v32, %v2368_v30 }
 0xfee   : > { %v2071_v36 = vmul.f32 %v3251_v34, %v3243_v20 }
 0xfef   : > { %3013 = vmatmul.mubr.msk.f32.vlgmr.msra.gmra.mrb[22].mxu1 %vm400_vm4, %v1904_v33  ;;  %v2754_v33 = vld [vmem:[#allocation2 + $0x1e4] ss:$0 sm:$0xff] }
 0xff0   : > { %3021 = vmatpush3.msra.mxu1 %v2073_v35  ;;  %3022 = vmatprep.mubr.msk.f32.mxu1 %vm3305_vm0, %v3306_v8 }
 0xff1   : > { %3142 = vmatprep.subr.bf16.mxu1 %v3304_v1 }
 0xff3   : > { %3023 = vmatmul.mubr.msk.f32.vlgmr.msra.gmra.mrb[24].mxu1 %vm400_vm4, %v2071_v36 }
 0xff4   : > { %3044 = vmatprep.mubr.msk.f32.mxu1 %vm3305_vm0, %v3306_v8  ;;  %3144 = vmatpush3.bf16.msra.mxu1 %v3143_v10 }
 0xff5   : > { %3145 = vmatprep.subr.bf16.mxu1 %v3304_v1 }
 0xff8   : > { %3147 = vmatpush3.bf16.msra.mxu1 %v3146_v12  ;;  %v2554_v12 = vld [vmem:[#allocation2 + $0x78] sm:$0xff] }
 0xff9   : > { %3160 = vmatprep.subr.bf16.mxu1 %v3304_v1 }
0x10ba   : > { %v1643_v43 = vpop.f32.mrb[18].mxu1 }
0x10bb   : > { %v2994_v45 = vpop.f32.mrb[19].mxu1 }
0x10be   : > { %v1810_v46 = vpop.f32.mrb[20].mxu1 }
0x10bf   : > { %2149 = vrot.lane.b32.xlu0 %v1810_v46, %s3318_s23  ;;  %v3004_v48 = vpop.f32.mrb[21].mxu1 }
0x10c0   : > { %v2756_v48 = vld [vmem:[#allocation2 + $0x1e5] ss:$0 sm:$0xff] }
0x10c2   : > { %v1977_v49 = vpop.f32.mrb[22].mxu1 }
0x10c3   : > { %2153 = vrot.lane.b32.xlu1 %v1977_v49, %s3319_s24  ;;  %v3014_v50 = vpop.f32.mrb[23].mxu1 }
0x10c6   : > { %v2144_v51 = vpop.f32.mrb[24].mxu1 }
0x10c7   : > { %2157 = vrot.lane.b32.xlu0 %v2144_v51, %s3320_s25  ;;  %v3024_v52 = vpop.f32.mrb[25].mxu1 }
0x1131   : > { %v2150_v47 = vpop.permute.xlu0 %2149 }
0x1132   : > { %v2160_v54 = vsel %vm400_vm4, %v1643_v43, %v2150_v47 }
0x1135   : > { %v2154_v53 = vpop.permute.xlu1 %2153 }
0x1136   : > { %v2161_v55 = vsel %vm1084_vm5, %v2160_v54, %v2154_v53 }
0x1139   : > { %v2158_v56 = vpop.permute.xlu0 %2157 }
0x113a   : > { %v2162_v57 = vsel %vm1086_vm6, %v2161_v55, %v2158_v56 }
0x113b   : > { %3034 = vmatmul.mubr.msk.f32.vlgmr.msra.gmra.mrb[18].mxu0 %vm287_vm3, %v2162_v57 }
0x113c   : > { %3063 = vmatprep.mubr.msk.f32.mxu0 %vm3305_vm0, %v3306_v8  ;;  %3150 = vmatpush3.bf16.msra.mxu0 %v3149_v23 }
0x113d   : > { %3151 = vmatprep.subr.bf16.mxu0 %v3304_v1 }
0x1140   : > { %3153 = vmatpush3.bf16.msra.mxu0 %v3152_v26 }
0x1141   : > { %3154 = vmatprep.subr.bf16.mxu0 %v3304_v1 }
0x1144   : > { %3156 = vmatpush3.bf16.msra.mxu0 %v3155_v29 }
0x1145   : > { %3157 = vmatprep.subr.bf16.mxu0 %v3304_v1 }
0x1148   : > { %3159 = vmatpush3.bf16.msra.mxu0 %v3158_v44 }
0x120e   : > { %v2241_v59 = vpop.f32.mrb[18].mxu0 }
0x120f   : > { %v2242_v60 = vadd.f32 %v2750_v58, %v2241_v59  ;;  %v3035_v62 = vpop.f32.mrb[19].mxu0  ;;  %v2474_v58 = vld [vmem:[#allocation2 + $0x50] sm:$0xff]  ;;  %v2475_v59 = vld [vmem:[#allocation2 + $0x58] sm:$0xff] }
0x1210   : > { %v2476_v62 = vld [vmem:[#allocation2 + $0x60] sm:$0xff] }
0x1211   : > { %v2245_v63 = vadd.f32 %v2242_v60, %v3529_v31  ;;  %v3161_v60 = vpack.c.bf16 %v2475_v59, %v2474_v58 }
0x1213   : > { %v2248_v0 = vsel %vm287_vm3, %v2245_v63, 0.0 }
0x1214   : > { %2249 = vadd.xlane.f32.xlu1 %v2248_v0 }
0x12a1   : > { %v2250_v2 = vpop.xlane.xlu1 %2249 }
0x12a2   : > { %v2251_v3 = vmul.f32 0.03125, %v2250_v2 }
0x12a4   : > { %v2252_v4 = vsub.f32 %v2245_v63, %v2251_v3  ;;  %v2477_v63 = vld [vmem:[#allocation2 + $0x68] sm:$0xff] }
0x12a5   : > { %v3164_v0 = vpack.c.bf16 %v2477_v63, %v2476_v62 }
0x12a6   : > { %v2253_v5 = vmul.f32 %v2252_v4, %v2252_v4 }
0x12a8   : > { %v2254_v6 = vsel %vm287_vm3, %v2253_v5, 0.0 }
0x12a9   : > { %2255 = vadd.xlane.f32.xlu0 %v2254_v6  ;;  %v2758_v6 = vld [vmem:[#allocation2 + $0x1e6] ss:$0 sm:$0xff] }
0x1336   : > { %v2256_v31 = vpop.xlane.xlu0 %2255 }
0x1337   : > { %v2257_v13 = vmul.f32 0.03125, %v2256_v31  ;;  %v2555_v31 = vld [vmem:[#allocation2 + $0x80] sm:$0xff] }
0x1339   : > { %v2258_v14 = vadd.f32 1e-12, %v2257_v13  ;;  %v3167_v13 = vpack.c.bf16 %v2554_v12, %v2553_v11 }
0x133b   : > { %3252 = vrsqrt.f32 %v2258_v14  ;;  %v2556_v14 = vld [vmem:[#allocation2 + $0x88] sm:$0xff] }
0x1345   : > { %v3253_v15 = vpop.eup %3252 }
0x1346   : > { %v2260_v17 = vmul.f32 %v3253_v15, %v2252_v4  ;;  %v3170_v15 = vpack.c.bf16 %v2556_v14, %v2555_v31 }
0x1348   : > { %v2265_v19 = vmul.f32 %v2752_v16, %v2260_v17  ;;  %v2478_v16 = vld [vmem:[#allocation2 + $0x92] sm:$0x1] }
0x134a   : > { %v2270_v20 = vadd.f32 %v2753_v18, %v2265_v19 }
0x134c   : > { %3045 = vmatmul.mubr.msk.f32.vlgmr.msra.gmra.mrb[26].mxu1 %vm287_vm3, %v2270_v20 }
0x134d   : > { %3074 = vmatprep.mubr.msk.f32.mxu1 %vm3305_vm0, %v3306_v8  ;;  %3162 = vmatpush3.bf16.msra.mxu1 %v3161_v60 }
0x134e   : > { %3163 = vmatprep.subr.bf16.mxu1 %v3304_v1 }
0x1351   : > { %3165 = vmatpush3.bf16.msra.mxu1 %v3164_v0 }
0x1352   : > { %3166 = vmatprep.subr.bf16.mxu1 %v3304_v1 }
0x141f   : > { %v2349_v34 = vpop.f32.mrb[26].mxu1 }
0x1420   : > { %v2350_v35 = vadd.f32 %v2754_v33, %v2349_v34  ;;  %v3046_v36 = vpop.f32.mrb[27].mxu1 }
0x1422   : > { %v2354_v37 = vmul.f32 0.044715, %v2350_v35  ;;  %v2353_v43 = vmul.f32 0.5, %v2350_v35 }
0x1424   : > { %v2355_v38 = vmul.f32 %v2354_v37, %v2350_v35 }
0x1426   : > { %v2356_v39 = vmul.f32 %v2355_v38, %v2350_v35 }
0x1428   : > { %v2357_v40 = vadd.f32 %v2356_v39, %v2350_v35 }
0x142a   : > { %v2358_v41 = vmul.f32 0.7978846, %v2357_v40 }
0x142c   : > { %3254 = vtanh.f32 %v2358_v41 }
0x1436   : > { %v3255_v42 = vpop.eup %3254 }
0x1437   : > { %v2360_v45 = vadd.f32 1.0, %v3255_v42 }
0x1439   : > { %v2361_v46 = vmul.f32 %v2360_v45, %v2353_v43 }
0x143b   : > { %3064 = vmatmul.mubr.msk.f32.vlgmr.msra.gmra.mrb[20].mxu0 %vm211_vm1, %v2361_v46 }
0x150e   : > { %v2444_v49 = vpop.f32.mrb[20].mxu0 }
0x150f   : > { %v2445_v50 = vadd.f32 %v2756_v48, %v2444_v49  ;;  %v3065_v51 = vpop.f32.mrb[21].mxu0 }
0x1511   : > { %v2448_v52 = vadd.f32 %v2445_v50, %v2270_v20 }
0x1513   : > { %v2451_v47 = vsel %vm287_vm3, %v2448_v52, 0.0 }
0x1514   : > { %2452 = vadd.xlane.f32.xlu0 %v2451_v47 }
0x15a1   : > { %v2453_v53 = vpop.xlane.xlu0 %2452 }
0x15a2   : > { %v2454_v54 = vmul.f32 0.03125, %v2453_v53 }
0x15a4   : > { %v2455_v55 = vsub.f32 %v2448_v52, %v2454_v54 }
0x15a6   : > { %v2456_v56 = vmul.f32 %v2455_v55, %v2455_v55 }
0x15a8   : > { %v2457_v57 = vsel %vm287_vm3, %v2456_v56, 0.0 }
0x15a9   : > { %2458 = vadd.xlane.f32.xlu1 %v2457_v57 }
0x1636   : > { %v2459_v2 = vpop.xlane.xlu1 %2458 }
0x1637   : > { %v2460_v3 = vmul.f32 0.03125, %v2459_v2 }
0x1639   : > { %v2461_v4 = vadd.f32 1e-12, %v2460_v3 }
0x163b   : > { %3256 = vrsqrt.f32 %v2461_v4 }
0x1645   : > { %v3257_v5 = vpop.eup %3256 }
0x1646   : > { %v2463_v7 = vmul.f32 %v3257_v5, %v2455_v55 }
0x1648   : > { %v2468_v10 = vmul.f32 %v2758_v6, %v2463_v7 }
0x164a   : > { %v2473_v61 = vadd.f32 %v2759_v9, %v2468_v10 }
0x164c   : > { %3075 = vmatmul.mubr.msk.f32.vlgmr.msra.gmra.mrb[28].mxu1 %vm287_vm3, %v2473_v61 }
0x164d   : > { %3085 = vmatprep.mubr.msk.f32.mxu1 %vm3305_vm0, %v3306_v8  ;;  %3168 = vmatpush3.bf16.msra.mxu1 %v3167_v13  ;;  %v2557_v8 = vld [vmem:[#allocation2 + $0x93] sm:$0x1] }
0x164e   : > { %3169 = vmatprep.subr.bf16.mxu1 %v3304_v1 }
0x1651   : > { %3171 = vmatpush3.bf16.msra.mxu1 %v3170_v15 }
0x171f   : > { %v2548_v17 = vpop.f32.mrb[28].mxu1 }
0x1720   : > { %v2549_v18 = vadd.f32 %v2548_v17, %v2478_v16  ;;  %v3076_v19 = vpop.f32.mrb[29].mxu1 }
0x1722   : > { %3258 = vtanh.f32 %v2549_v18 }
0x172c   : > { %v3259_v20 = vpop.eup %3258 }
0x172d   : > { %3086 = vmatmul.mubr.msk.f32.vlgmr.msra.gmra.mrb[30].mxu1 %vm287_vm3, %v3259_v20 }
0x1800   : > { %v2627_v21 = vpop.f32.mrb[30].mxu1 }
0x1801   : > { %v2628_v22 = vadd.f32 %v2627_v21, %v2557_v8  ;;  %v3087_v23 = vpop.f32.mrb[31].mxu1 }
0x1803   : > { %2631 = vst [vmem:[%s192_s28] sm:$0x1] %v2628_v22 }
0x1804 PF: > { %s14_s12 = sadd.s32 1, %s3298_s12  }
0x1805   : > { %p11_p3 = scmp.ge.s32.totalorder %s14_s12, 4  }
0x1807   :  { %13 = sbr.rel (!%p11_p3) target bundleno = 1 (0x1), region = 70 }
0x180e   :  { %2649 = vsyncpa [#allocation3], 1 }
0x180f   :  { %2651 = vsyncpa [#allocation3 + $0x1], 1 }

</bundles_post_ra>
